<compile_context>
chip_gen: v5e
topology: v5e:2x2
jax: 0.10.0
libtpu: 0.0.40
codegen_flags: <defaults>
</compile_context>

<pallas_src>
import math
import functools

import jax
import jax.numpy as jnp
from jax.experimental import pallas as pl
from jax.experimental.pallas import tpu as pltpu


def _round_up(x, m):
    return (x + m - 1) // m * m


# ----------------------------------------------------------------------------
# Kernel
# ----------------------------------------------------------------------------
def _fusion_kernel(num_classes, prod_dtype,
                   x_ref, pairs_ref, wbig_ref, bbig_ref, uw2_ref, ub2_ref,
                   sel_ref, feat_ref, attnw_ref, unc_ref):
    _, TB, H = x_ref.shape
    C = num_classes
    H2p = uw2_ref.shape[-1]                       # 128-aligned uncertainty width
    qkv_w = (2 + C) * H                           # attn_proj output width
    unc_start = wbig_ref.shape[1] - 4 * H2p       # 128-aligned start of unc blocks
    inv_sqrt_h = 1.0 / math.sqrt(H)

    pairs = pairs_ref[...]                        # (TB, 1) f32

    # ---- single fused MXU matmul -------------------------------------------
    w = wbig_ref[...]
    x4 = x_ref[...]                               # (4, TB, H)
    if TB % 8 == 0:
        x = x4.reshape(4 * TB, H)                 # free, tile-aligned reshape
    else:                                         # tiny-batch path (demo sizes)
        x = jnp.concatenate([x4[0], x4[1], x4[2], x4[3]], axis=0)
    x = x.astype(w.dtype)
    y = jnp.dot(x, w, preferred_element_type=jnp.float32) + bbig_ref[...]

    qs, vs, us = [], [], []
    for m in range(4):                            # modality order: tr, sea, sh, cxr
        ym = y[m * TB:(m + 1) * TB, :]
        qs.append(ym[:, 0:H])
        vs.append(ym[:, H:2 * H])
        # uncertainty net m: ReLU(L1) -> <., uw2> + ub2 -> sigmoid
        h = jnp.maximum(ym[:, unc_start + m * H2p: unc_start + (m + 1) * H2p], 0.0)
        us.append(jax.nn.sigmoid(
            jnp.sum(h * uw2_ref[m], axis=-1, keepdims=True) + ub2_ref[m]))  # (TB,1)

    # uncertainties packed in dict order [trend, seasonal, cxr, shared]
    unc_ref[...] = jnp.concatenate([us[0], us[1], us[3], us[2]], axis=1)

    # ---- uncertainty-weighted query mean (1/4, 1/3, 1/sqrt(H) folded in) ----
    qw = [qs[m] * (1.0 - us[m]) for m in range(4)]
    q_sum3 = qw[0] + qw[1] + qw[2]
    q_mean = (pairs * ((q_sum3 + qw[3]) * 0.25)
              + (1.0 - pairs) * (q_sum3 * (1.0 / 3.0))) * inv_sqrt_h        # (TB,H)

    # ---- attention logits, processed per modality (low peak VMEM) -----------
    sel = sel_ref[...]
    qp = q_mean.astype(prod_dtype)
    q_rep = jnp.concatenate([qp] * C, axis=1)     # (TB, C*H), built once, reused 4x
    unpaired = pairs == 0.0

    logits = []
    for m in range(4):
        k_m = y[m * TB:(m + 1) * TB, 2 * H:qkv_w].astype(prod_dtype)  # (TB, C*H)
        p_m = (k_m * q_rep).astype(sel.dtype)
        logits.append(jnp.dot(p_m, sel, preferred_element_type=jnp.float32))
    # mask the cxr modality (stack index 3) for unpaired samples
    logits[3] = jnp.where(unpaired, -jnp.inf, logits[3])

    # ---- softmax over the 4 modalities, feat = attn @ v ---------------------
    m_max = jnp.maximum(jnp.maximum(logits[0], logits[1]),
                        jnp.maximum(logits[2], logits[3]))
    es = [jnp.exp(l - m_max) for l in logits]
    inv_den = pl.reciprocal(es[0] + es[1] + es[2] + es[3], approx=True)

    feat = None
    for m in range(4):
        a_m = es[m] * inv_den                                    # (TB, C)
        attnw_ref[m, :, :] = a_m.astype(attnw_ref.dtype)         # modality-major store
        contrib = a_m[:, :, None] * vs[m][:, None, :]            # (TB, C, H)
        feat = contrib if feat is None else feat + contrib
    feat_ref[...] = feat.astype(feat_ref.dtype)
    # NOTE: pred_logits / pred_final (final_pred_fc + diagonal + sigmoid) are
    # computed in the PyTorch forward but never returned, so they are omitted.


# ----------------------------------------------------------------------------
# Generation detection & VMEM budgeting
# ----------------------------------------------------------------------------
def _tpu_target():
    """Returns (has_bf16_valu, physical_vmem_bytes, tensorcores_per_chip)."""
    kind = ''
    try:
        dev = jax.devices()[0]
        if dev.platform == 'tpu':
            kind = dev.device_kind.lower()
    except Exception:
        pass
    vmem = 0
    try:
        vmem = int(pltpu.get_tpu_info().vmem_capacity_bytes)
    except Exception:
        vmem = 0
    if any(t in kind for t in ('v2', 'v3', 'v4', 'v5')):
        return False, vmem or (128 << 20), 1      # no bf16 VALU on v5e and older
    if 'v6' in kind:
        return True, vmem or (128 << 20), 1
    if 'v7' in kind or 'tpu7' in kind or '7x' in kind:
        return True, vmem or (64 << 20), 2        # 64 MiB VMEM / TC, 2 TCs
    return True, vmem or (64 << 20), 1            # unknown: conservative


def _pick_batch_tile(B, H, C, W, H2p, mxu_isz, prod_isz, vmem_limit, num_tc,
                     weight_buffers):
    """Largest sublane-aligned batch tile whose per-step footprint fits VMEM."""
    budget = int(vmem_limit * 0.75)
    cp8 = _round_up(C, 8)
    sel_lanes = _round_up(C, 128)
    weight_bytes = weight_buffers * (
        H * W * mxu_isz                           # w_big
        + 8 * W * 4                               # b_big (sublane padded)
        + 4 * 8 * H2p * 4                         # uw2 (sublane padded)
        + 4 * 8 * 128 * 4                         # ub2
        + C * H * sel_lanes * mxu_isz)            # sel (lane padded)
    # double-buffered streaming blocks, per batch row
    io_row = 2 * (4 * H * 4 + 128 * 4 + cp8 * H * 4 + 4 * 128 * 4 + 128 * 4)
    # single-buffered in-kernel intermediates, per batch row
    mid_row = (4 * W * 4                          # fused activation y (f32)
               + 4 * H * 2                        # bf16 copy of x
               + 3 * C * H * prod_isz             # q_rep + k_m + p_m (one modality)
               + 2 * C * H * 4                    # feat accumulator + contribution
               + 16 * H * 4)                      # q/v/qw slices & misc
    avail = budget - weight_bytes
    if avail <= 0:
        return min(8, B)
    cap = max(8, int(avail // (io_row + mid_row)))
    cap = min(cap, 1024)
    if num_tc >= 2 and B >= 16:                   # keep >= 2 grid steps on v7x
        cap = min(cap, max(8, (B // 2) // 8 * 8))
    if cap >= B:
        return B
    cap -= cap % 8
    cap = max(cap, 8)
    tb = cap
    while tb >= 8 and B % tb != 0:
        tb -= 8
    # non-divisor fallback: use capped tile with a cdiv grid (padded last block)
    return tb if tb >= 8 and B % tb == 0 else cap


def _const_spec(shape, weight_buffers):
    """BlockSpec for a VMEM-resident weight whose block index never changes."""
    maps = {2: lambda i: (0, 0), 3: lambda i: (0, 0, 0)}
    index_map = maps[len(shape)]
    if weight_buffers == 1:
        # constant-index operand: don't waste VMEM on a second buffer
        return pl.BlockSpec(shape, index_map, pipeline_mode=pl.Buffered(1))
    return pl.BlockSpec(shape, index_map)


# ----------------------------------------------------------------------------
# Parameters & wrapper
# ----------------------------------------------------------------------------
def init_params(key, hidden_size, num_classes):
    """Deterministic synthetic parameters (JAX (in, out) weight convention)."""
    H, C = hidden_size, num_classes
    ks = jax.random.split(key, 6)

    def lin(k, fan_in, shape):
        return jax.random.normal(k, shape, jnp.float32) / math.sqrt(fan_in)

    return {
        # attn_proj: Linear(H, (2+C)*H)
        'wq': lin(ks[0], H, (H, (2 + C) * H)),
        'bq': lin(ks[1], H, (1, (2 + C) * H)),
        # 4 uncertainty nets in dict order [trend, seasonal, cxr, shared]
        'uw1': lin(ks[2], H, (4, H, H // 2)),
        'ub1': lin(ks[3], H, (4, 1, H // 2)),
        'uw2': lin(ks[4], H // 2, (4, 1, H // 2)),
        'ub2': lin(ks[5], H // 2, (4, 1, 1)),
    }


def uncertainty_aware_modal_fusion(feat_trend, feat_sea, feat_cxr, feat_shared,
                                   pairs, params, num_classes,
                                   mxu_dtype=jnp.bfloat16,
                                   out_dtype=jnp.float32,
                                   batch_tile=None):
    B, H = feat_trend.shape
    C = num_classes
    H2 = H // 2
    H2p = _round_up(H2, 128)                      # 128-lane aligned unc blocks
    qkv_w = (2 + C) * H
    unc_start = _round_up(qkv_w, 128)
    W = unc_start + 4 * H2p

    # ------- host-side parameter packing (tiny, traced once) -----------------
    # reorder uncertainty nets: dict order [tr, sea, cxr, sh] -> stack [tr, sea, sh, cxr]
    order = jnp.array([0, 1, 3, 2], dtype=jnp.int32)
    uw1 = params['uw1'][order]
    ub1 = params['ub1'][order]
    uw2 = params['uw2'][order]
    ub2 = params['ub2'][order]

    w_big = jnp.zeros((H, W), jnp.float32).at[:, :qkv_w].set(params['wq'])
    b_big = jnp.zeros((1, W), jnp.float32).at[:, :qkv_w].set(params['bq'])
    for m in range(4):
        c0 = unc_start + m * H2p
        w_big = w_big.at[:, c0:c0 + H2].set(uw1[m])
        b_big = b_big.at[:, c0:c0 + H2].set(ub1[m])
    w_big = w_big.astype(mxu_dtype)
    uw2p = jnp.zeros((4, 1, H2p), jnp.float32).at[:, :, :H2].set(uw2)

    # 0/1 class-selection matrix turning the segmented logits reduction into a matmul
    sel = (jnp.arange(C * H, dtype=jnp.int32)[:, None] // H
           == jnp.arange(C, dtype=jnp.int32)[None, :]).astype(mxu_dtype)

    # pre-stack modalities: [trend, seasonal, shared, cxr] -> (4, B, H), one DMA stream
    x_all = jnp.stack([feat_trend, feat_sea, feat_shared, feat_cxr], axis=0)

    # ------- generation-aware dtypes / VMEM budget ----------------------------
    has_bf16_valu, phys_vmem, num_tc = _tpu_target()
    prod_dtype = jnp.float32
    if has_bf16_valu and jnp.dtype(mxu_dtype) != jnp.dtype(jnp.float32):
        prod_dtype = mxu_dtype                    # bf16 k*q product on v6e/v7x
    vmem_limit = max(32 << 20, min(int(phys_vmem) - (16 << 20), 112 << 20))
    mxu_isz = jnp.dtype(mxu_dtype).itemsize
    prod_isz = jnp.dtype(prod_dtype).itemsize

    kernel = functools.partial(_fusion_kernel, C, prod_dtype)

    def _run(weight_buffers):
        TB = batch_tile if batch_tile is not None else _pick_batch_tile(
            B, H, C, W, H2p, mxu_isz, prod_isz, vmem_limit, num_tc, weight_buffers)
        grid = (pl.cdiv(B, TB),)

        in_specs = [
            pl.BlockSpec((4, TB, H), lambda i: (0, i, 0)),      # stacked modalities
            pl.BlockSpec((TB, 1), lambda i: (i, 0)),            # pairs
            _const_spec(w_big.shape, weight_buffers),           # fused weights
            _const_spec(b_big.shape, weight_buffers),
            _const_spec(uw2p.shape, weight_buffers),
            _const_spec(ub2.shape, weight_buffers),
            _const_spec(sel.shape, weight_buffers),
        ]
        out_specs = (
            pl.BlockSpec((TB, C, H), lambda i: (i, 0, 0)),      # feat_final
            pl.BlockSpec((4, TB, C), lambda i: (0, i, 0)),      # attn (modality-major)
            pl.BlockSpec((TB, 4), lambda i: (i, 0)),            # packed uncertainties
        )
        out_shapes = (
            jax.ShapeDtypeStruct((B, C, H), out_dtype),
            jax.ShapeDtypeStruct((4, B, C), jnp.float32),
            jax.ShapeDtypeStruct((B, 4), jnp.float32),
        )
        flops = (2 * 4 * B * H * W            # fused qkv + uncertainty layer-1
                 + 2 * 4 * B * (C * H) * C    # logits selection matmuls
                 + 2 * B * C * 4 * H)         # attn (x) v accumulation
        cost = pl.CostEstimate(
            flops=int(flops),
            transcendentals=int(B * (4 + 5 * C)),
            bytes_accessed=int(4 * (4 * B * H + B)
                               + mxu_isz * (w_big.size + sel.size)
                               + 4 * (b_big.size + uw2p.size + ub2.size)
                               + jnp.dtype(out_dtype).itemsize * B * C * H
                               + 4 * (4 * B * C + 4 * B)),
        )
        return pl.pallas_call(
            kernel,
            out_shape=out_shapes,
            grid=grid,
            in_specs=in_specs,
            out_specs=out_specs,
            compiler_params=pltpu.CompilerParams(
                dimension_semantics=("parallel",),
                vmem_limit_bytes=int(vmem_limit)),
            cost_estimate=cost,
        )(x_all, pairs, w_big, b_big, uw2p, ub2, sel)

    try:
        feat_final, attn_mm, unc = _run(1)        # single-buffered resident weights
    except Exception:
        feat_final, attn_mm, unc = _run(2)        # fallback: default double-buffering

    attn_weights = jnp.transpose(attn_mm, (1, 2, 0))            # (B, C, 4)
    uncertainties = {
        'trend': unc[:, 0:1],
        'seasonal': unc[:, 1:2],
        'cxr': unc[:, 2:3],
        'shared': unc[:, 3:4],
    }
    return feat_final, uncertainties, attn_weights


# ----------------------------------------------------------------------------
# Pure-JAX reference (transcription of the PyTorch forward) for validation
# ----------------------------------------------------------------------------
def reference_forward(ft, fs, fc, fsh, pairs, params, num_classes,
                      mxu_dtype=jnp.float32):
    H = ft.shape[1]
    C = num_classes
    cast = lambda a: a.astype(mxu_dtype)

    def unc_net(x, m):
        h = jnp.maximum(
            jnp.dot(cast(x), cast(params['uw1'][m]),
                    preferred_element_type=jnp.float32) + params['ub1'][m], 0.0)
        return jax.nn.sigmoid(
            jnp.sum(h * params['uw2'][m], axis=-1, keepdims=True) + params['ub2'][m])

    u = {'trend': unc_net(ft, 0), 'seasonal': unc_net(fs, 1),
         'cxr': unc_net(fc, 2), 'shared': unc_net(fsh, 3)}

    attn_input = jnp.stack([ft, fs, fsh, fc], axis=1)                # (B,4,H)
    qkvs = jnp.einsum('bmh,hk->bmk', cast(attn_input), cast(params['wq']),
                      preferred_element_type=jnp.float32) + params['bq']
    chunks = jnp.split(qkvs, 2 + C, axis=-1)
    q, v = chunks[0], chunks[1]
    ks = jnp.stack(chunks[2:], axis=1)                               # (B,C,4,H)

    uwt = jnp.stack([1 - u['trend'], 1 - u['seasonal'],
                     1 - u['shared'], 1 - u['cxr']], axis=1)         # (B,4,1)
    qw = q * uwt
    q_mean = pairs * qw.mean(axis=1) + (1 - pairs) * qw[:, :-1].mean(axis=1)

    logits = jnp.einsum('bd,bnkd->bnk', q_mean, ks) / math.sqrt(H)
    mask = (jnp.arange(4)[None, None, :] == 3) & (pairs[:, :, None] == 0)
    logits = jnp.where(mask, -jnp.inf, logits)
    attn = jax.nn.softmax(logits, axis=-1)
    feat = jnp.einsum('bnk,bkd->bnd', attn, v)
    return feat, u, attn


if __name__ == "__main__":
    B, H, C = 2, 32, 6
    key = jax.random.PRNGKey(0)
    k1, k2, k3, k4 = jax.random.split(key, 4)
    feat_trend = jax.random.normal(k1, (B, H), jnp.float32)
    feat_sea = jax.random.normal(k2, (B, H), jnp.float32)
    feat_cxr = jax.random.normal(k3, (B, H), jnp.float32)
    feat_shared = jax.random.normal(k4, (B, H), jnp.float32)
    pairs = jnp.array([[1.0], [0.0]], jnp.float32)   # sample 0 paired, sample 1 not

    params = init_params(jax.random.PRNGKey(42), H, C)

    def check(mxu_dtype, tol):
        feat, unc, attn = uncertainty_aware_modal_fusion(
            feat_trend, feat_sea, feat_cxr, feat_shared, pairs, params, C,
            mxu_dtype=mxu_dtype)
        jax.block_until_ready((feat, unc, attn))
        rfeat, runc, rattn = reference_forward(
            feat_trend, feat_sea, feat_cxr, feat_shared, pairs, params, C,
            mxu_dtype=mxu_dtype)
        assert jnp.allclose(feat, rfeat, atol=tol, rtol=tol), "feat mismatch"
        assert jnp.allclose(attn, rattn, atol=tol, rtol=tol), "attn mismatch"
        for name in ('trend', 'seasonal', 'cxr', 'shared'):
            assert jnp.allclose(unc[name], runc[name], atol=tol, rtol=tol), name

    # exact-path validation (f32 MXU/product), then the default bf16 fast path
    check(jnp.float32, 2e-3)
    check(jnp.bfloat16, 5e-2)

    print("KERNEL_OK")
</pallas_src>

<mosaic_0001>
module attributes {stable_mosaic.version = 11 : i64} {
  func.func @_fusion_kernel(%arg0: i32, %arg1: memref<4x2x32xf32, #tpu.memory_space<vmem>>, %arg2: memref<2x1xf32, #tpu.memory_space<vmem>>, %arg3: memref<32x768xf32, #tpu.memory_space<vmem>>, %arg4: memref<1x768xf32, #tpu.memory_space<vmem>>, %arg5: memref<4x1x128xf32, #tpu.memory_space<vmem>>, %arg6: memref<4x1x1xf32, #tpu.memory_space<vmem>>, %arg7: memref<192x6xf32, #tpu.memory_space<vmem>>, %arg8: memref<2x6x32xf32, #tpu.memory_space<vmem>>, %arg9: memref<4x2x6xf32, #tpu.memory_space<vmem>>, %arg10: memref<2x4xf32, #tpu.memory_space<vmem>>) attributes {dimension_semantics = [#tpu.dimension_semantics<parallel>], iteration_bounds = array<i64: 1>, scalar_prefetch = 0 : i64, scratch_operands = 0 : i64, tpu.core_type = #tpu.core_type<tc>, window_params = [{transform_indices = @transform_0, window_bounds = array<i64: 4, 2, 32>}, {transform_indices = @transform_1, window_bounds = array<i64: 2, 1>}, {pipeline_mode = #tpu.pipeline_mode<synchronous>, transform_indices = @transform_2, window_bounds = array<i64: 32, 768>}, {pipeline_mode = #tpu.pipeline_mode<synchronous>, transform_indices = @transform_3, window_bounds = array<i64: 1, 768>}, {pipeline_mode = #tpu.pipeline_mode<synchronous>, transform_indices = @transform_4, window_bounds = array<i64: 4, 1, 128>}, {pipeline_mode = #tpu.pipeline_mode<synchronous>, transform_indices = @transform_5, window_bounds = array<i64: 4, 1, 1>}, {pipeline_mode = #tpu.pipeline_mode<synchronous>, transform_indices = @transform_6, window_bounds = array<i64: 192, 6>}, {transform_indices = @transform_7, window_bounds = array<i64: 2, 6, 32>}, {transform_indices = @transform_8, window_bounds = array<i64: 4, 2, 6>}, {transform_indices = @transform_9, window_bounds = array<i64: 2, 4>}]} {
    %c0 = arith.constant 0 : index
    %c0_0 = arith.constant 0 : index
    %0 = vector.load %arg2[%c0, %c0_0] : memref<2x1xf32, #tpu.memory_space<vmem>>, vector<2x1xf32>
    %c0_1 = arith.constant 0 : index
    %c0_2 = arith.constant 0 : index
    %1 = vector.load %arg3[%c0_1, %c0_2] : memref<32x768xf32, #tpu.memory_space<vmem>>, vector<32x768xf32>
    %c0_3 = arith.constant 0 : index
    %c0_4 = arith.constant 0 : index
    %c0_5 = arith.constant 0 : index
    %2 = vector.load %arg1[%c0_3, %c0_4, %c0_5] : memref<4x2x32xf32, #tpu.memory_space<vmem>>, vector<4x2x32xf32>
    %3 = vector.extract_strided_slice %2 {offsets = [0, 0, 0], sizes = [1, 2, 32], strides = [1, 1, 1]} : vector<4x2x32xf32> to vector<1x2x32xf32>
    %4 = vector.shape_cast %3 : vector<1x2x32xf32> to vector<2x32xf32>
    %5 = vector.extract_strided_slice %2 {offsets = [1, 0, 0], sizes = [1, 2, 32], strides = [1, 1, 1]} : vector<4x2x32xf32> to vector<1x2x32xf32>
    %6 = vector.shape_cast %5 : vector<1x2x32xf32> to vector<2x32xf32>
    %7 = vector.extract_strided_slice %2 {offsets = [2, 0, 0], sizes = [1, 2, 32], strides = [1, 1, 1]} : vector<4x2x32xf32> to vector<1x2x32xf32>
    %8 = vector.shape_cast %7 : vector<1x2x32xf32> to vector<2x32xf32>
    %9 = vector.extract_strided_slice %2 {offsets = [3, 0, 0], sizes = [1, 2, 32], strides = [1, 1, 1]} : vector<4x2x32xf32> to vector<1x2x32xf32>
    %10 = vector.shape_cast %9 : vector<1x2x32xf32> to vector<2x32xf32>
    %11 = tpu.concatenate %4, %6, %8, %10 in 0 : vector<2x32xf32>, vector<2x32xf32>, vector<2x32xf32>, vector<2x32xf32> -> vector<8x32xf32>
    %cst = arith.constant dense<0.000000e+00> : vector<8x768xf32>
    %12 = tpu.matmul %11, %1, %cst {dimension_numbers = #tpu.dot_dimension_numbers<[1], [0], [0], [1], [0, 0, 1, 1], [], []>} : vector<8x32xf32>, vector<32x768xf32>, vector<8x768xf32> -> vector<8x768xf32>
    %c0_6 = arith.constant 0 : index
    %c0_7 = arith.constant 0 : index
    %13 = vector.load %arg4[%c0_6, %c0_7] : memref<1x768xf32, #tpu.memory_space<vmem>>, vector<1x768xf32>
    %14 = vector.broadcast %13 : vector<1x768xf32> to vector<8x768xf32>
    %15 = arith.addf %12, %14 : vector<8x768xf32>
    %16 = vector.extract_strided_slice %15 {offsets = [0, 0], sizes = [2, 768], strides = [1, 1]} : vector<8x768xf32> to vector<2x768xf32>
    %17 = vector.extract_strided_slice %16 {offsets = [0, 0], sizes = [2, 32], strides = [1, 1]} : vector<2x768xf32> to vector<2x32xf32>
    %18 = vector.extract_strided_slice %16 {offsets = [0, 32], sizes = [2, 32], strides = [1, 1]} : vector<2x768xf32> to vector<2x32xf32>
    %19 = vector.extract_strided_slice %16 {offsets = [0, 256], sizes = [2, 128], strides = [1, 1]} : vector<2x768xf32> to vector<2x128xf32>
    %cst_8 = arith.constant 0.000000e+00 : f32
    %20 = vector.broadcast %cst_8 : f32 to vector<2x128xf32>
    %21 = arith.maximumf %19, %20 : vector<2x128xf32>
    %c0_9 = arith.constant 0 : index
    %c0_10 = arith.constant 0 : index
    %c0_11 = arith.constant 0 : index
    %22 = vector.load %arg5[%c0_9, %c0_10, %c0_11] : memref<4x1x128xf32, #tpu.memory_space<vmem>>, vector<1x1x128xf32>
    %23 = vector.shape_cast %22 : vector<1x1x128xf32> to vector<1x128xf32>
    %24 = vector.broadcast %23 : vector<1x128xf32> to vector<2x128xf32>
    %25 = arith.mulf %21, %24 : vector<2x128xf32>
    %cst_12 = arith.constant dense<0.000000e+00> : vector<2xf32>
    %26 = vector.multi_reduction <add>, %25, %cst_12 [1] : vector<2x128xf32> to vector<2xf32>
    %27 = vector.shape_cast %26 : vector<2xf32> to vector<2x1xf32>
    %c0_13 = arith.constant 0 : index
    %c0_14 = arith.constant 0 : index
    %c0_15 = arith.constant 0 : index
    %28 = vector.load %arg6[%c0_13, %c0_14, %c0_15] : memref<4x1x1xf32, #tpu.memory_space<vmem>>, vector<1x1x1xf32>
    %29 = vector.shape_cast %28 : vector<1x1x1xf32> to vector<1x1xf32>
    %30 = vector.broadcast %29 : vector<1x1xf32> to vector<2x1xf32>
    %31 = arith.addf %27, %30 : vector<2x1xf32>
    %32 = arith.negf %31 : vector<2x1xf32>
    %33 = math.exp %32 : vector<2x1xf32>
    %cst_16 = arith.constant 1.000000e+00 : f32
    %34 = vector.broadcast %cst_16 : f32 to vector<2x1xf32>
    %35 = arith.addf %34, %33 : vector<2x1xf32>
    %36 = arith.divf %34, %35 : vector<2x1xf32>
    %37 = vector.extract_strided_slice %15 {offsets = [2, 0], sizes = [2, 768], strides = [1, 1]} : vector<8x768xf32> to vector<2x768xf32>
    %38 = vector.extract_strided_slice %37 {offsets = [0, 0], sizes = [2, 32], strides = [1, 1]} : vector<2x768xf32> to vector<2x32xf32>
    %39 = vector.extract_strided_slice %37 {offsets = [0, 32], sizes = [2, 32], strides = [1, 1]} : vector<2x768xf32> to vector<2x32xf32>
    %40 = vector.extract_strided_slice %37 {offsets = [0, 384], sizes = [2, 128], strides = [1, 1]} : vector<2x768xf32> to vector<2x128xf32>
    %cst_17 = arith.constant 0.000000e+00 : f32
    %41 = vector.broadcast %cst_17 : f32 to vector<2x128xf32>
    %42 = arith.maximumf %40, %41 : vector<2x128xf32>
    %c1 = arith.constant 1 : index
    %c0_18 = arith.constant 0 : index
    %c0_19 = arith.constant 0 : index
    %43 = vector.load %arg5[%c1, %c0_18, %c0_19] : memref<4x1x128xf32, #tpu.memory_space<vmem>>, vector<1x1x128xf32>
    %44 = vector.shape_cast %43 : vector<1x1x128xf32> to vector<1x128xf32>
    %45 = vector.broadcast %44 : vector<1x128xf32> to vector<2x128xf32>
    %46 = arith.mulf %42, %45 : vector<2x128xf32>
    %cst_20 = arith.constant dense<0.000000e+00> : vector<2xf32>
    %47 = vector.multi_reduction <add>, %46, %cst_20 [1] : vector<2x128xf32> to vector<2xf32>
    %48 = vector.shape_cast %47 : vector<2xf32> to vector<2x1xf32>
    %c1_21 = arith.constant 1 : index
    %c0_22 = arith.constant 0 : index
    %c0_23 = arith.constant 0 : index
    %49 = vector.load %arg6[%c1_21, %c0_22, %c0_23] : memref<4x1x1xf32, #tpu.memory_space<vmem>>, vector<1x1x1xf32>
    %50 = vector.shape_cast %49 : vector<1x1x1xf32> to vector<1x1xf32>
    %51 = vector.broadcast %50 : vector<1x1xf32> to vector<2x1xf32>
    %52 = arith.addf %48, %51 : vector<2x1xf32>
    %53 = arith.negf %52 : vector<2x1xf32>
    %54 = math.exp %53 : vector<2x1xf32>
    %cst_24 = arith.constant 1.000000e+00 : f32
    %55 = vector.broadcast %cst_24 : f32 to vector<2x1xf32>
    %56 = arith.addf %55, %54 : vector<2x1xf32>
    %57 = arith.divf %55, %56 : vector<2x1xf32>
    %58 = vector.extract_strided_slice %15 {offsets = [4, 0], sizes = [2, 768], strides = [1, 1]} : vector<8x768xf32> to vector<2x768xf32>
    %59 = vector.extract_strided_slice %58 {offsets = [0, 0], sizes = [2, 32], strides = [1, 1]} : vector<2x768xf32> to vector<2x32xf32>
    %60 = vector.extract_strided_slice %58 {offsets = [0, 32], sizes = [2, 32], strides = [1, 1]} : vector<2x768xf32> to vector<2x32xf32>
    %61 = vector.extract_strided_slice %58 {offsets = [0, 512], sizes = [2, 128], strides = [1, 1]} : vector<2x768xf32> to vector<2x128xf32>
    %cst_25 = arith.constant 0.000000e+00 : f32
    %62 = vector.broadcast %cst_25 : f32 to vector<2x128xf32>
    %63 = arith.maximumf %61, %62 : vector<2x128xf32>
    %c2 = arith.constant 2 : index
    %c0_26 = arith.constant 0 : index
    %c0_27 = arith.constant 0 : index
    %64 = vector.load %arg5[%c2, %c0_26, %c0_27] : memref<4x1x128xf32, #tpu.memory_space<vmem>>, vector<1x1x128xf32>
    %65 = vector.shape_cast %64 : vector<1x1x128xf32> to vector<1x128xf32>
    %66 = vector.broadcast %65 : vector<1x128xf32> to vector<2x128xf32>
    %67 = arith.mulf %63, %66 : vector<2x128xf32>
    %cst_28 = arith.constant dense<0.000000e+00> : vector<2xf32>
    %68 = vector.multi_reduction <add>, %67, %cst_28 [1] : vector<2x128xf32> to vector<2xf32>
    %69 = vector.shape_cast %68 : vector<2xf32> to vector<2x1xf32>
    %c2_29 = arith.constant 2 : index
    %c0_30 = arith.constant 0 : index
    %c0_31 = arith.constant 0 : index
    %70 = vector.load %arg6[%c2_29, %c0_30, %c0_31] : memref<4x1x1xf32, #tpu.memory_space<vmem>>, vector<1x1x1xf32>
    %71 = vector.shape_cast %70 : vector<1x1x1xf32> to vector<1x1xf32>
    %72 = vector.broadcast %71 : vector<1x1xf32> to vector<2x1xf32>
    %73 = arith.addf %69, %72 : vector<2x1xf32>
    %74 = arith.negf %73 : vector<2x1xf32>
    %75 = math.exp %74 : vector<2x1xf32>
    %cst_32 = arith.constant 1.000000e+00 : f32
    %76 = vector.broadcast %cst_32 : f32 to vector<2x1xf32>
    %77 = arith.addf %76, %75 : vector<2x1xf32>
    %78 = arith.divf %76, %77 : vector<2x1xf32>
    %79 = vector.extract_strided_slice %15 {offsets = [6, 0], sizes = [2, 768], strides = [1, 1]} : vector<8x768xf32> to vector<2x768xf32>
    %80 = vector.extract_strided_slice %79 {offsets = [0, 0], sizes = [2, 32], strides = [1, 1]} : vector<2x768xf32> to vector<2x32xf32>
    %81 = vector.extract_strided_slice %79 {offsets = [0, 32], sizes = [2, 32], strides = [1, 1]} : vector<2x768xf32> to vector<2x32xf32>
    %82 = vector.extract_strided_slice %79 {offsets = [0, 640], sizes = [2, 128], strides = [1, 1]} : vector<2x768xf32> to vector<2x128xf32>
    %cst_33 = arith.constant 0.000000e+00 : f32
    %83 = vector.broadcast %cst_33 : f32 to vector<2x128xf32>
    %84 = arith.maximumf %82, %83 : vector<2x128xf32>
    %c3 = arith.constant 3 : index
    %c0_34 = arith.constant 0 : index
    %c0_35 = arith.constant 0 : index
    %85 = vector.load %arg5[%c3, %c0_34, %c0_35] : memref<4x1x128xf32, #tpu.memory_space<vmem>>, vector<1x1x128xf32>
    %86 = vector.shape_cast %85 : vector<1x1x128xf32> to vector<1x128xf32>
    %87 = vector.broadcast %86 : vector<1x128xf32> to vector<2x128xf32>
    %88 = arith.mulf %84, %87 : vector<2x128xf32>
    %cst_36 = arith.constant dense<0.000000e+00> : vector<2xf32>
    %89 = vector.multi_reduction <add>, %88, %cst_36 [1] : vector<2x128xf32> to vector<2xf32>
    %90 = vector.shape_cast %89 : vector<2xf32> to vector<2x1xf32>
    %c3_37 = arith.constant 3 : index
    %c0_38 = arith.constant 0 : index
    %c0_39 = arith.constant 0 : index
    %91 = vector.load %arg6[%c3_37, %c0_38, %c0_39] : memref<4x1x1xf32, #tpu.memory_space<vmem>>, vector<1x1x1xf32>
    %92 = vector.shape_cast %91 : vector<1x1x1xf32> to vector<1x1xf32>
    %93 = vector.broadcast %92 : vector<1x1xf32> to vector<2x1xf32>
    %94 = arith.addf %90, %93 : vector<2x1xf32>
    %95 = arith.negf %94 : vector<2x1xf32>
    %96 = math.exp %95 : vector<2x1xf32>
    %cst_40 = arith.constant 1.000000e+00 : f32
    %97 = vector.broadcast %cst_40 : f32 to vector<2x1xf32>
    %98 = arith.addf %97, %96 : vector<2x1xf32>
    %99 = arith.divf %97, %98 : vector<2x1xf32>
    %100 = tpu.concatenate %36, %57, %99, %78 in 1 : vector<2x1xf32>, vector<2x1xf32>, vector<2x1xf32>, vector<2x1xf32> -> vector<2x4xf32>
    %c0_41 = arith.constant 0 : index
    %c0_42 = arith.constant 0 : index
    %101 = vector.load %arg10[%c0_41, %c0_42] : memref<2x4xf32, #tpu.memory_space<vmem>>, vector<2x4xf32>
    tpu.vector_store %arg10[%c0_41, %c0_42], %100 {strides = array<i32>} : memref<2x4xf32, #tpu.memory_space<vmem>>, vector<2x4xf32>,
    %cst_43 = arith.constant 1.000000e+00 : f32
    %102 = vector.broadcast %cst_43 : f32 to vector<2x1xf32>
    %103 = arith.subf %102, %36 : vector<2x1xf32>
    %104 = vector.broadcast %103 : vector<2x1xf32> to vector<2x32xf32>
    %105 = arith.mulf %17, %104 : vector<2x32xf32>
    %cst_44 = arith.constant 1.000000e+00 : f32
    %106 = vector.broadcast %cst_44 : f32 to vector<2x1xf32>
    %107 = arith.subf %106, %57 : vector<2x1xf32>
    %108 = vector.broadcast %107 : vector<2x1xf32> to vector<2x32xf32>
    %109 = arith.mulf %38, %108 : vector<2x32xf32>
    %cst_45 = arith.constant 1.000000e+00 : f32
    %110 = vector.broadcast %cst_45 : f32 to vector<2x1xf32>
    %111 = arith.subf %110, %78 : vector<2x1xf32>
    %112 = vector.broadcast %111 : vector<2x1xf32> to vector<2x32xf32>
    %113 = arith.mulf %59, %112 : vector<2x32xf32>
    %cst_46 = arith.constant 1.000000e+00 : f32
    %114 = vector.broadcast %cst_46 : f32 to vector<2x1xf32>
    %115 = arith.subf %114, %99 : vector<2x1xf32>
    %116 = vector.broadcast %115 : vector<2x1xf32> to vector<2x32xf32>
    %117 = arith.mulf %80, %116 : vector<2x32xf32>
    %118 = arith.addf %105, %109 : vector<2x32xf32>
    %119 = arith.addf %118, %113 : vector<2x32xf32>
    %120 = arith.addf %119, %117 : vector<2x32xf32>
    %cst_47 = arith.constant 2.500000e-01 : f32
    %121 = vector.broadcast %cst_47 : f32 to vector<2x32xf32>
    %122 = arith.mulf %120, %121 : vector<2x32xf32>
    %123 = vector.broadcast %0 : vector<2x1xf32> to vector<2x32xf32>
    %124 = arith.mulf %123, %122 : vector<2x32xf32>
    %cst_48 = arith.constant 1.000000e+00 : f32
    %125 = vector.broadcast %cst_48 : f32 to vector<2x1xf32>
    %126 = arith.subf %125, %0 : vector<2x1xf32>
    %cst_49 = arith.constant 0.333333343 : f32
    %127 = vector.broadcast %cst_49 : f32 to vector<2x32xf32>
    %128 = arith.mulf %119, %127 : vector<2x32xf32>
    %129 = vector.broadcast %126 : vector<2x1xf32> to vector<2x32xf32>
    %130 = arith.mulf %129, %128 : vector<2x32xf32>
    %131 = arith.addf %124, %130 : vector<2x32xf32>
    %cst_50 = arith.constant 0.176776692 : f32
    %132 = vector.broadcast %cst_50 : f32 to vector<2x32xf32>
    %133 = arith.mulf %131, %132 : vector<2x32xf32>
    %c0_51 = arith.constant 0 : index
    %c0_52 = arith.constant 0 : index
    %134 = vector.load %arg7[%c0_51, %c0_52] : memref<192x6xf32, #tpu.memory_space<vmem>>, vector<192x6xf32>
    %135 = tpu.concatenate %133, %133, %133, %133, %133, %133 in 1 : vector<2x32xf32>, vector<2x32xf32>, vector<2x32xf32>, vector<2x32xf32>, vector<2x32xf32>, vector<2x32xf32> -> vector<2x192xf32>
    %cst_53 = arith.constant 0.000000e+00 : f32
    %136 = vector.broadcast %cst_53 : f32 to vector<2x1xf32>
    %137 = arith.cmpf oeq, %0, %136 : vector<2x1xf32>
    %138 = vector.extract_strided_slice %15 {offsets = [0, 64], sizes = [2, 192], strides = [1, 1]} : vector<8x768xf32> to vector<2x192xf32>
    %139 = arith.mulf %138, %135 : vector<2x192xf32>
    %cst_54 = arith.constant dense<0.000000e+00> : vector<2x6xf32>
    %140 = tpu.matmul %139, %134, %cst_54 {dimension_numbers = #tpu.dot_dimension_numbers<[1], [0], [0], [1], [0, 0, 1, 1], [], []>} : vector<2x192xf32>, vector<192x6xf32>, vector<2x6xf32> -> vector<2x6xf32>
    %141 = vector.extract_strided_slice %15 {offsets = [2, 64], sizes = [2, 192], strides = [1, 1]} : vector<8x768xf32> to vector<2x192xf32>
    %142 = arith.mulf %141, %135 : vector<2x192xf32>
    %cst_55 = arith.constant dense<0.000000e+00> : vector<2x6xf32>
    %143 = tpu.matmul %142, %134, %cst_55 {dimension_numbers = #tpu.dot_dimension_numbers<[1], [0], [0], [1], [0, 0, 1, 1], [], []>} : vector<2x192xf32>, vector<192x6xf32>, vector<2x6xf32> -> vector<2x6xf32>
    %144 = vector.extract_strided_slice %15 {offsets = [4, 64], sizes = [2, 192], strides = [1, 1]} : vector<8x768xf32> to vector<2x192xf32>
    %145 = arith.mulf %144, %135 : vector<2x192xf32>
    %cst_56 = arith.constant dense<0.000000e+00> : vector<2x6xf32>
    %146 = tpu.matmul %145, %134, %cst_56 {dimension_numbers = #tpu.dot_dimension_numbers<[1], [0], [0], [1], [0, 0, 1, 1], [], []>} : vector<2x192xf32>, vector<192x6xf32>, vector<2x6xf32> -> vector<2x6xf32>
    %147 = vector.extract_strided_slice %15 {offsets = [6, 64], sizes = [2, 192], strides = [1, 1]} : vector<8x768xf32> to vector<2x192xf32>
    %148 = arith.mulf %147, %135 : vector<2x192xf32>
    %cst_57 = arith.constant dense<0.000000e+00> : vector<2x6xf32>
    %149 = tpu.matmul %148, %134, %cst_57 {dimension_numbers = #tpu.dot_dimension_numbers<[1], [0], [0], [1], [0, 0, 1, 1], [], []>} : vector<2x192xf32>, vector<192x6xf32>, vector<2x6xf32> -> vector<2x6xf32>
    %cst_58 = arith.constant 0xFF800000 : f32
    %150 = vector.shape_cast %137 : vector<2x1xi1> to vector<2x1xi1>
    %151 = vector.broadcast %150 : vector<2x1xi1> to vector<2x6xi1>
    %152 = vector.broadcast %cst_58 : f32 to vector<2x6xf32>
    %153 = arith.select %151, %152, %149 : vector<2x6xi1>, vector<2x6xf32>
    %154 = arith.maximumf %140, %143 : vector<2x6xf32>
    %155 = arith.maximumf %146, %153 : vector<2x6xf32>
    %156 = arith.maximumf %154, %155 : vector<2x6xf32>
    %157 = arith.subf %140, %156 : vector<2x6xf32>
    %158 = math.exp %157 : vector<2x6xf32>
    %159 = arith.subf %143, %156 : vector<2x6xf32>
    %160 = math.exp %159 : vector<2x6xf32>
    %161 = arith.subf %146, %156 : vector<2x6xf32>
    %162 = math.exp %161 : vector<2x6xf32>
    %163 = arith.subf %153, %156 : vector<2x6xf32>
    %164 = math.exp %163 : vector<2x6xf32>
    %165 = arith.addf %158, %160 : vector<2x6xf32>
    %166 = arith.addf %165, %162 : vector<2x6xf32>
    %167 = arith.addf %166, %164 : vector<2x6xf32>
    %168 = tpu.reciprocal %167 {approx = true} : vector<2x6xf32> -> vector<2x6xf32>
    %169 = arith.mulf %158, %168 : vector<2x6xf32>
    %c0_59 = arith.constant 0 : index
    %c0_60 = arith.constant 0 : index
    %c0_61 = arith.constant 0 : index
    %170 = vector.load %arg9[%c0_59, %c0_60, %c0_61] : memref<4x2x6xf32, #tpu.memory_space<vmem>>, vector<1x2x6xf32>
    %171 = vector.shape_cast %170 : vector<1x2x6xf32> to vector<2x6xf32>
    %172 = vector.shape_cast %169 : vector<2x6xf32> to vector<1x2x6xf32>
    tpu.vector_store %arg9[%c0_59, %c0_60, %c0_61], %172 {strides = array<i32>} : memref<4x2x6xf32, #tpu.memory_space<vmem>>, vector<1x2x6xf32>,
    %173 = vector.shape_cast %169 : vector<2x6xf32> to vector<2x6x1xf32>
    %174 = vector.shape_cast %18 : vector<2x32xf32> to vector<2x1x32xf32>
    %175 = vector.broadcast %173 : vector<2x6x1xf32> to vector<2x6x32xf32>
    %176 = vector.broadcast %174 : vector<2x1x32xf32> to vector<2x6x32xf32>
    %177 = arith.mulf %175, %176 : vector<2x6x32xf32>
    %178 = arith.mulf %160, %168 : vector<2x6xf32>
    %c1_62 = arith.constant 1 : index
    %c0_63 = arith.constant 0 : index
    %c0_64 = arith.constant 0 : index
    %179 = vector.load %arg9[%c1_62, %c0_63, %c0_64] : memref<4x2x6xf32, #tpu.memory_space<vmem>>, vector<1x2x6xf32>
    %180 = vector.shape_cast %179 : vector<1x2x6xf32> to vector<2x6xf32>
    %181 = vector.shape_cast %178 : vector<2x6xf32> to vector<1x2x6xf32>
    tpu.vector_store %arg9[%c1_62, %c0_63, %c0_64], %181 {strides = array<i32>} : memref<4x2x6xf32, #tpu.memory_space<vmem>>, vector<1x2x6xf32>,
    %182 = vector.shape_cast %178 : vector<2x6xf32> to vector<2x6x1xf32>
    %183 = vector.shape_cast %39 : vector<2x32xf32> to vector<2x1x32xf32>
    %184 = vector.broadcast %182 : vector<2x6x1xf32> to vector<2x6x32xf32>
    %185 = vector.broadcast %183 : vector<2x1x32xf32> to vector<2x6x32xf32>
    %186 = arith.mulf %184, %185 : vector<2x6x32xf32>
    %187 = arith.addf %177, %186 : vector<2x6x32xf32>
    %188 = arith.mulf %162, %168 : vector<2x6xf32>
    %c2_65 = arith.constant 2 : index
    %c0_66 = arith.constant 0 : index
    %c0_67 = arith.constant 0 : index
    %189 = vector.load %arg9[%c2_65, %c0_66, %c0_67] : memref<4x2x6xf32, #tpu.memory_space<vmem>>, vector<1x2x6xf32>
    %190 = vector.shape_cast %189 : vector<1x2x6xf32> to vector<2x6xf32>
    %191 = vector.shape_cast %188 : vector<2x6xf32> to vector<1x2x6xf32>
    tpu.vector_store %arg9[%c2_65, %c0_66, %c0_67], %191 {strides = array<i32>} : memref<4x2x6xf32, #tpu.memory_space<vmem>>, vector<1x2x6xf32>,
    %192 = vector.shape_cast %188 : vector<2x6xf32> to vector<2x6x1xf32>
    %193 = vector.shape_cast %60 : vector<2x32xf32> to vector<2x1x32xf32>
    %194 = vector.broadcast %192 : vector<2x6x1xf32> to vector<2x6x32xf32>
    %195 = vector.broadcast %193 : vector<2x1x32xf32> to vector<2x6x32xf32>
    %196 = arith.mulf %194, %195 : vector<2x6x32xf32>
    %197 = arith.addf %187, %196 : vector<2x6x32xf32>
    %198 = arith.mulf %164, %168 : vector<2x6xf32>
    %c3_68 = arith.constant 3 : index
    %c0_69 = arith.constant 0 : index
    %c0_70 = arith.constant 0 : index
    %199 = vector.load %arg9[%c3_68, %c0_69, %c0_70] : memref<4x2x6xf32, #tpu.memory_space<vmem>>, vector<1x2x6xf32>
    %200 = vector.shape_cast %199 : vector<1x2x6xf32> to vector<2x6xf32>
    %201 = vector.shape_cast %198 : vector<2x6xf32> to vector<1x2x6xf32>
    tpu.vector_store %arg9[%c3_68, %c0_69, %c0_70], %201 {strides = array<i32>} : memref<4x2x6xf32, #tpu.memory_space<vmem>>, vector<1x2x6xf32>,
    %202 = vector.shape_cast %198 : vector<2x6xf32> to vector<2x6x1xf32>
    %203 = vector.shape_cast %81 : vector<2x32xf32> to vector<2x1x32xf32>
    %204 = vector.broadcast %202 : vector<2x6x1xf32> to vector<2x6x32xf32>
    %205 = vector.broadcast %203 : vector<2x1x32xf32> to vector<2x6x32xf32>
    %206 = arith.mulf %204, %205 : vector<2x6x32xf32>
    %207 = arith.addf %197, %206 : vector<2x6x32xf32>
    %c0_71 = arith.constant 0 : index
    %c0_72 = arith.constant 0 : index
    %c0_73 = arith.constant 0 : index
    %208 = vector.load %arg8[%c0_71, %c0_72, %c0_73] : memref<2x6x32xf32, #tpu.memory_space<vmem>>, vector<2x6x32xf32>
    tpu.vector_store %arg8[%c0_71, %c0_72, %c0_73], %207 {strides = array<i32>} : memref<2x6x32xf32, #tpu.memory_space<vmem>>, vector<2x6x32xf32>,
    return
  }
  func.func @transform_0(%arg0: i32) -> (i32, i32, i32) {
    %c0_i32 = arith.constant 0 : i32
    %c0_i32_0 = arith.constant 0 : i32
    %c0_i32_1 = arith.constant 0 : i32
    return %c0_i32, %arg0, %c0_i32_0 : i32, i32, i32
  }
  func.func @transform_1(%arg0: i32) -> (i32, i32) {
    %c0_i32 = arith.constant 0 : i32
    %c0_i32_0 = arith.constant 0 : i32
    return %arg0, %c0_i32 : i32, i32
  }
  func.func @transform_2(%arg0: i32) -> (i32, i32) {
    %c0_i32 = arith.constant 0 : i32
    %c0_i32_0 = arith.constant 0 : i32
    %c0_i32_1 = arith.constant 0 : i32
    return %c0_i32, %c0_i32_0 : i32, i32
  }
  func.func @transform_3(%arg0: i32) -> (i32, i32) {
    %c0_i32 = arith.constant 0 : i32
    %c0_i32_0 = arith.constant 0 : i32
    %c0_i32_1 = arith.constant 0 : i32
    return %c0_i32, %c0_i32_0 : i32, i32
  }
  func.func @transform_4(%arg0: i32) -> (i32, i32, i32) {
    %c0_i32 = arith.constant 0 : i32
    %c0_i32_0 = arith.constant 0 : i32
    %c0_i32_1 = arith.constant 0 : i32
    %c0_i32_2 = arith.constant 0 : i32
    return %c0_i32, %c0_i32_0, %c0_i32_1 : i32, i32, i32
  }
  func.func @transform_5(%arg0: i32) -> (i32, i32, i32) {
    %c0_i32 = arith.constant 0 : i32
    %c0_i32_0 = arith.constant 0 : i32
    %c0_i32_1 = arith.constant 0 : i32
    %c0_i32_2 = arith.constant 0 : i32
    return %c0_i32, %c0_i32_0, %c0_i32_1 : i32, i32, i32
  }
  func.func @transform_6(%arg0: i32) -> (i32, i32) {
    %c0_i32 = arith.constant 0 : i32
    %c0_i32_0 = arith.constant 0 : i32
    %c0_i32_1 = arith.constant 0 : i32
    return %c0_i32, %c0_i32_0 : i32, i32
  }
  func.func @transform_7(%arg0: i32) -> (i32, i32, i32) {
    %c0_i32 = arith.constant 0 : i32
    %c0_i32_0 = arith.constant 0 : i32
    %c0_i32_1 = arith.constant 0 : i32
    return %arg0, %c0_i32, %c0_i32_0 : i32, i32, i32
  }
  func.func @transform_8(%arg0: i32) -> (i32, i32, i32) {
    %c0_i32 = arith.constant 0 : i32
    %c0_i32_0 = arith.constant 0 : i32
    %c0_i32_1 = arith.constant 0 : i32
    return %c0_i32, %arg0, %c0_i32_0 : i32, i32, i32
  }
  func.func @transform_9(%arg0: i32) -> (i32, i32) {
    %c0_i32 = arith.constant 0 : i32
    %c0_i32_0 = arith.constant 0 : i32
    return %arg0, %c0_i32 : i32, i32
  }
}

module attributes {stable_mosaic.version = 11 : i64} {
  func.func @_fusion_kernel(%arg0: i32, %arg1: memref<4x2x32xf32, #tpu.memory_space<vmem>>, %arg2: memref<2x1xf32, #tpu.memory_space<vmem>>, %arg3: memref<32x768xf32, #tpu.memory_space<vmem>>, %arg4: memref<1x768xf32, #tpu.memory_space<vmem>>, %arg5: memref<4x1x128xf32, #tpu.memory_space<vmem>>, %arg6: memref<4x1x1xf32, #tpu.memory_space<vmem>>, %arg7: memref<192x6xf32, #tpu.memory_space<vmem>>, %arg8: memref<2x6x32xf32, #tpu.memory_space<vmem>>, %arg9: memref<4x2x6xf32, #tpu.memory_space<vmem>>, %arg10: memref<2x4xf32, #tpu.memory_space<vmem>>) attributes {dimension_semantics = [#tpu.dimension_semantics<parallel>], iteration_bounds = array<i64: 1>, scalar_prefetch = 0 : i64, scratch_operands = 0 : i64, tpu.core_type = #tpu.core_type<tc>, window_params = [{transform_indices = @transform_0, window_bounds = array<i64: 4, 2, 32>}, {transform_indices = @transform_1, window_bounds = array<i64: 2, 1>}, {pipeline_mode = #tpu.pipeline_mode<synchronous>, transform_indices = @transform_2, window_bounds = array<i64: 32, 768>}, {pipeline_mode = #tpu.pipeline_mode<synchronous>, transform_indices = @transform_3, window_bounds = array<i64: 1, 768>}, {pipeline_mode = #tpu.pipeline_mode<synchronous>, transform_indices = @transform_4, window_bounds = array<i64: 4, 1, 128>}, {pipeline_mode = #tpu.pipeline_mode<synchronous>, transform_indices = @transform_5, window_bounds = array<i64: 4, 1, 1>}, {pipeline_mode = #tpu.pipeline_mode<synchronous>, transform_indices = @transform_6, window_bounds = array<i64: 192, 6>}, {transform_indices = @transform_7, window_bounds = array<i64: 2, 6, 32>}, {transform_indices = @transform_8, window_bounds = array<i64: 4, 2, 6>}, {transform_indices = @transform_9, window_bounds = array<i64: 2, 4>}]} {
    %c0 = arith.constant 0 : index
    %c0_0 = arith.constant 0 : index
    %0 = vector.load %arg2[%c0, %c0_0] : memref<2x1xf32, #tpu.memory_space<vmem>>, vector<2x1xf32>
    %c0_1 = arith.constant 0 : index
    %c0_2 = arith.constant 0 : index
    %1 = vector.load %arg3[%c0_1, %c0_2] : memref<32x768xf32, #tpu.memory_space<vmem>>, vector<32x768xf32>
    %c0_3 = arith.constant 0 : index
    %c0_4 = arith.constant 0 : index
    %c0_5 = arith.constant 0 : index
    %2 = vector.load %arg1[%c0_3, %c0_4, %c0_5] : memref<4x2x32xf32, #tpu.memory_space<vmem>>, vector<4x2x32xf32>
    %3 = vector.extract_strided_slice %2 {offsets = [0, 0, 0], sizes = [1, 2, 32], strides = [1, 1, 1]} : vector<4x2x32xf32> to vector<1x2x32xf32>
    %4 = vector.shape_cast %3 : vector<1x2x32xf32> to vector<2x32xf32>
    %5 = vector.extract_strided_slice %2 {offsets = [1, 0, 0], sizes = [1, 2, 32], strides = [1, 1, 1]} : vector<4x2x32xf32> to vector<1x2x32xf32>
    %6 = vector.shape_cast %5 : vector<1x2x32xf32> to vector<2x32xf32>
    %7 = vector.extract_strided_slice %2 {offsets = [2, 0, 0], sizes = [1, 2, 32], strides = [1, 1, 1]} : vector<4x2x32xf32> to vector<1x2x32xf32>
    %8 = vector.shape_cast %7 : vector<1x2x32xf32> to vector<2x32xf32>
    %9 = vector.extract_strided_slice %2 {offsets = [3, 0, 0], sizes = [1, 2, 32], strides = [1, 1, 1]} : vector<4x2x32xf32> to vector<1x2x32xf32>
    %10 = vector.shape_cast %9 : vector<1x2x32xf32> to vector<2x32xf32>
    %11 = tpu.concatenate %4, %6, %8, %10 in 0 : vector<2x32xf32>, vector<2x32xf32>, vector<2x32xf32>, vector<2x32xf32> -> vector<8x32xf32>
    %cst = arith.constant dense<0.000000e+00> : vector<8x768xf32>
    %12 = tpu.matmul %11, %1, %cst {dimension_numbers = #tpu.dot_dimension_numbers<[1], [0], [0], [1], [0, 0, 1, 1], [], []>} : vector<8x32xf32>, vector<32x768xf32>, vector<8x768xf32> -> vector<8x768xf32>
    %c0_6 = arith.constant 0 : index
    %c0_7 = arith.constant 0 : index
    %13 = vector.load %arg4[%c0_6, %c0_7] : memref<1x768xf32, #tpu.memory_space<vmem>>, vector<1x768xf32>
    %14 = vector.broadcast %13 : vector<1x768xf32> to vector<8x768xf32>
    %15 = arith.addf %12, %14 : vector<8x768xf32>
    %16 = vector.extract_strided_slice %15 {offsets = [0, 0], sizes = [2, 768], strides = [1, 1]} : vector<8x768xf32> to vector<2x768xf32>
    %17 = vector.extract_strided_slice %16 {offsets = [0, 0], sizes = [2, 32], strides = [1, 1]} : vector<2x768xf32> to vector<2x32xf32>
    %18 = vector.extract_strided_slice %16 {offsets = [0, 32], sizes = [2, 32], strides = [1, 1]} : vector<2x768xf32> to vector<2x32xf32>
    %19 = vector.extract_strided_slice %16 {offsets = [0, 256], sizes = [2, 128], strides = [1, 1]} : vector<2x768xf32> to vector<2x128xf32>
    %cst_8 = arith.constant 0.000000e+00 : f32
    %20 = vector.broadcast %cst_8 : f32 to vector<2x128xf32>
    %21 = arith.maximumf %19, %20 : vector<2x128xf32>
    %c0_9 = arith.constant 0 : index
    %c0_10 = arith.constant 0 : index
    %c0_11 = arith.constant 0 : index
    %22 = vector.load %arg5[%c0_9, %c0_10, %c0_11] : memref<4x1x128xf32, #tpu.memory_space<vmem>>, vector<1x1x128xf32>
    %23 = vector.shape_cast %22 : vector<1x1x128xf32> to vector<1x128xf32>
    %24 = vector.broadcast %23 : vector<1x128xf32> to vector<2x128xf32>
    %25 = arith.mulf %21, %24 : vector<2x128xf32>
    %cst_12 = arith.constant dense<0.000000e+00> : vector<2xf32>
    %26 = vector.multi_reduction <add>, %25, %cst_12 [1] : vector<2x128xf32> to vector<2xf32>
    %27 = vector.shape_cast %26 : vector<2xf32> to vector<2x1xf32>
    %c0_13 = arith.constant 0 : index
    %c0_14 = arith.constant 0 : index
    %c0_15 = arith.constant 0 : index
    %28 = vector.load %arg6[%c0_13, %c0_14, %c0_15] : memref<4x1x1xf32, #tpu.memory_space<vmem>>, vector<1x1x1xf32>
    %29 = vector.shape_cast %28 : vector<1x1x1xf32> to vector<1x1xf32>
    %30 = vector.broadcast %29 : vector<1x1xf32> to vector<2x1xf32>
    %31 = arith.addf %27, %30 : vector<2x1xf32>
    %32 = arith.negf %31 : vector<2x1xf32>
    %33 = math.exp %32 : vector<2x1xf32>
    %cst_16 = arith.constant 1.000000e+00 : f32
    %34 = vector.broadcast %cst_16 : f32 to vector<2x1xf32>
    %35 = arith.addf %34, %33 : vector<2x1xf32>
    %36 = arith.divf %34, %35 : vector<2x1xf32>
    %37 = vector.extract_strided_slice %15 {offsets = [2, 0], sizes = [2, 768], strides = [1, 1]} : vector<8x768xf32> to vector<2x768xf32>
    %38 = vector.extract_strided_slice %37 {offsets = [0, 0], sizes = [2, 32], strides = [1, 1]} : vector<2x768xf32> to vector<2x32xf32>
    %39 = vector.extract_strided_slice %37 {offsets = [0, 32], sizes = [2, 32], strides = [1, 1]} : vector<2x768xf32> to vector<2x32xf32>
    %40 = vector.extract_strided_slice %37 {offsets = [0, 384], sizes = [2, 128], strides = [1, 1]} : vector<2x768xf32> to vector<2x128xf32>
    %cst_17 = arith.constant 0.000000e+00 : f32
    %41 = vector.broadcast %cst_17 : f32 to vector<2x128xf32>
    %42 = arith.maximumf %40, %41 : vector<2x128xf32>
    %c1 = arith.constant 1 : index
    %c0_18 = arith.constant 0 : index
    %c0_19 = arith.constant 0 : index
    %43 = vector.load %arg5[%c1, %c0_18, %c0_19] : memref<4x1x128xf32, #tpu.memory_space<vmem>>, vector<1x1x128xf32>
    %44 = vector.shape_cast %43 : vector<1x1x128xf32> to vector<1x128xf32>
    %45 = vector.broadcast %44 : vector<1x128xf32> to vector<2x128xf32>
    %46 = arith.mulf %42, %45 : vector<2x128xf32>
    %cst_20 = arith.constant dense<0.000000e+00> : vector<2xf32>
    %47 = vector.multi_reduction <add>, %46, %cst_20 [1] : vector<2x128xf32> to vector<2xf32>
    %48 = vector.shape_cast %47 : vector<2xf32> to vector<2x1xf32>
    %c1_21 = arith.constant 1 : index
    %c0_22 = arith.constant 0 : index
    %c0_23 = arith.constant 0 : index
    %49 = vector.load %arg6[%c1_21, %c0_22, %c0_23] : memref<4x1x1xf32, #tpu.memory_space<vmem>>, vector<1x1x1xf32>
    %50 = vector.shape_cast %49 : vector<1x1x1xf32> to vector<1x1xf32>
    %51 = vector.broadcast %50 : vector<1x1xf32> to vector<2x1xf32>
    %52 = arith.addf %48, %51 : vector<2x1xf32>
    %53 = arith.negf %52 : vector<2x1xf32>
    %54 = math.exp %53 : vector<2x1xf32>
    %cst_24 = arith.constant 1.000000e+00 : f32
    %55 = vector.broadcast %cst_24 : f32 to vector<2x1xf32>
    %56 = arith.addf %55, %54 : vector<2x1xf32>
    %57 = arith.divf %55, %56 : vector<2x1xf32>
    %58 = vector.extract_strided_slice %15 {offsets = [4, 0], sizes = [2, 768], strides = [1, 1]} : vector<8x768xf32> to vector<2x768xf32>
    %59 = vector.extract_strided_slice %58 {offsets = [0, 0], sizes = [2, 32], strides = [1, 1]} : vector<2x768xf32> to vector<2x32xf32>
    %60 = vector.extract_strided_slice %58 {offsets = [0, 32], sizes = [2, 32], strides = [1, 1]} : vector<2x768xf32> to vector<2x32xf32>
    %61 = vector.extract_strided_slice %58 {offsets = [0, 512], sizes = [2, 128], strides = [1, 1]} : vector<2x768xf32> to vector<2x128xf32>
    %cst_25 = arith.constant 0.000000e+00 : f32
    %62 = vector.broadcast %cst_25 : f32 to vector<2x128xf32>
    %63 = arith.maximumf %61, %62 : vector<2x128xf32>
    %c2 = arith.constant 2 : index
    %c0_26 = arith.constant 0 : index
    %c0_27 = arith.constant 0 : index
    %64 = vector.load %arg5[%c2, %c0_26, %c0_27] : memref<4x1x128xf32, #tpu.memory_space<vmem>>, vector<1x1x128xf32>
    %65 = vector.shape_cast %64 : vector<1x1x128xf32> to vector<1x128xf32>
    %66 = vector.broadcast %65 : vector<1x128xf32> to vector<2x128xf32>
    %67 = arith.mulf %63, %66 : vector<2x128xf32>
    %cst_28 = arith.constant dense<0.000000e+00> : vector<2xf32>
    %68 = vector.multi_reduction <add>, %67, %cst_28 [1] : vector<2x128xf32> to vector<2xf32>
    %69 = vector.shape_cast %68 : vector<2xf32> to vector<2x1xf32>
    %c2_29 = arith.constant 2 : index
    %c0_30 = arith.constant 0 : index
    %c0_31 = arith.constant 0 : index
    %70 = vector.load %arg6[%c2_29, %c0_30, %c0_31] : memref<4x1x1xf32, #tpu.memory_space<vmem>>, vector<1x1x1xf32>
    %71 = vector.shape_cast %70 : vector<1x1x1xf32> to vector<1x1xf32>
    %72 = vector.broadcast %71 : vector<1x1xf32> to vector<2x1xf32>
    %73 = arith.addf %69, %72 : vector<2x1xf32>
    %74 = arith.negf %73 : vector<2x1xf32>
    %75 = math.exp %74 : vector<2x1xf32>
    %cst_32 = arith.constant 1.000000e+00 : f32
    %76 = vector.broadcast %cst_32 : f32 to vector<2x1xf32>
    %77 = arith.addf %76, %75 : vector<2x1xf32>
    %78 = arith.divf %76, %77 : vector<2x1xf32>
    %79 = vector.extract_strided_slice %15 {offsets = [6, 0], sizes = [2, 768], strides = [1, 1]} : vector<8x768xf32> to vector<2x768xf32>
    %80 = vector.extract_strided_slice %79 {offsets = [0, 0], sizes = [2, 32], strides = [1, 1]} : vector<2x768xf32> to vector<2x32xf32>
    %81 = vector.extract_strided_slice %79 {offsets = [0, 32], sizes = [2, 32], strides = [1, 1]} : vector<2x768xf32> to vector<2x32xf32>
    %82 = vector.extract_strided_slice %79 {offsets = [0, 640], sizes = [2, 128], strides = [1, 1]} : vector<2x768xf32> to vector<2x128xf32>
    %cst_33 = arith.constant 0.000000e+00 : f32
    %83 = vector.broadcast %cst_33 : f32 to vector<2x128xf32>
    %84 = arith.maximumf %82, %83 : vector<2x128xf32>
    %c3 = arith.constant 3 : index
    %c0_34 = arith.constant 0 : index
    %c0_35 = arith.constant 0 : index
    %85 = vector.load %arg5[%c3, %c0_34, %c0_35] : memref<4x1x128xf32, #tpu.memory_space<vmem>>, vector<1x1x128xf32>
    %86 = vector.shape_cast %85 : vector<1x1x128xf32> to vector<1x128xf32>
    %87 = vector.broadcast %86 : vector<1x128xf32> to vector<2x128xf32>
    %88 = arith.mulf %84, %87 : vector<2x128xf32>
    %cst_36 = arith.constant dense<0.000000e+00> : vector<2xf32>
    %89 = vector.multi_reduction <add>, %88, %cst_36 [1] : vector<2x128xf32> to vector<2xf32>
    %90 = vector.shape_cast %89 : vector<2xf32> to vector<2x1xf32>
    %c3_37 = arith.constant 3 : index
    %c0_38 = arith.constant 0 : index
    %c0_39 = arith.constant 0 : index
    %91 = vector.load %arg6[%c3_37, %c0_38, %c0_39] : memref<4x1x1xf32, #tpu.memory_space<vmem>>, vector<1x1x1xf32>
    %92 = vector.shape_cast %91 : vector<1x1x1xf32> to vector<1x1xf32>
    %93 = vector.broadcast %92 : vector<1x1xf32> to vector<2x1xf32>
    %94 = arith.addf %90, %93 : vector<2x1xf32>
    %95 = arith.negf %94 : vector<2x1xf32>
    %96 = math.exp %95 : vector<2x1xf32>
    %cst_40 = arith.constant 1.000000e+00 : f32
    %97 = vector.broadcast %cst_40 : f32 to vector<2x1xf32>
    %98 = arith.addf %97, %96 : vector<2x1xf32>
    %99 = arith.divf %97, %98 : vector<2x1xf32>
    %100 = tpu.concatenate %36, %57, %99, %78 in 1 : vector<2x1xf32>, vector<2x1xf32>, vector<2x1xf32>, vector<2x1xf32> -> vector<2x4xf32>
    %c0_41 = arith.constant 0 : index
    %c0_42 = arith.constant 0 : index
    %101 = vector.load %arg10[%c0_41, %c0_42] : memref<2x4xf32, #tpu.memory_space<vmem>>, vector<2x4xf32>
    tpu.vector_store %arg10[%c0_41, %c0_42], %100 {strides = array<i32>} : memref<2x4xf32, #tpu.memory_space<vmem>>, vector<2x4xf32>,
    %cst_43 = arith.constant 1.000000e+00 : f32
    %102 = vector.broadcast %cst_43 : f32 to vector<2x1xf32>
    %103 = arith.subf %102, %36 : vector<2x1xf32>
    %104 = vector.broadcast %103 : vector<2x1xf32> to vector<2x32xf32>
    %105 = arith.mulf %17, %104 : vector<2x32xf32>
    %cst_44 = arith.constant 1.000000e+00 : f32
    %106 = vector.broadcast %cst_44 : f32 to vector<2x1xf32>
    %107 = arith.subf %106, %57 : vector<2x1xf32>
    %108 = vector.broadcast %107 : vector<2x1xf32> to vector<2x32xf32>
    %109 = arith.mulf %38, %108 : vector<2x32xf32>
    %cst_45 = arith.constant 1.000000e+00 : f32
    %110 = vector.broadcast %cst_45 : f32 to vector<2x1xf32>
    %111 = arith.subf %110, %78 : vector<2x1xf32>
    %112 = vector.broadcast %111 : vector<2x1xf32> to vector<2x32xf32>
    %113 = arith.mulf %59, %112 : vector<2x32xf32>
    %cst_46 = arith.constant 1.000000e+00 : f32
    %114 = vector.broadcast %cst_46 : f32 to vector<2x1xf32>
    %115 = arith.subf %114, %99 : vector<2x1xf32>
    %116 = vector.broadcast %115 : vector<2x1xf32> to vector<2x32xf32>
    %117 = arith.mulf %80, %116 : vector<2x32xf32>
    %118 = arith.addf %105, %109 : vector<2x32xf32>
    %119 = arith.addf %118, %113 : vector<2x32xf32>
    %120 = arith.addf %119, %117 : vector<2x32xf32>
    %cst_47 = arith.constant 2.500000e-01 : f32
    %121 = vector.broadcast %cst_47 : f32 to vector<2x32xf32>
    %122 = arith.mulf %120, %121 : vector<2x32xf32>
    %123 = vector.broadcast %0 : vector<2x1xf32> to vector<2x32xf32>
    %124 = arith.mulf %123, %122 : vector<2x32xf32>
    %cst_48 = arith.constant 1.000000e+00 : f32
    %125 = vector.broadcast %cst_48 : f32 to vector<2x1xf32>
    %126 = arith.subf %125, %0 : vector<2x1xf32>
    %cst_49 = arith.constant 0.333333343 : f32
    %127 = vector.broadcast %cst_49 : f32 to vector<2x32xf32>
    %128 = arith.mulf %119, %127 : vector<2x32xf32>
    %129 = vector.broadcast %126 : vector<2x1xf32> to vector<2x32xf32>
    %130 = arith.mulf %129, %128 : vector<2x32xf32>
    %131 = arith.addf %124, %130 : vector<2x32xf32>
    %cst_50 = arith.constant 0.176776692 : f32
    %132 = vector.broadcast %cst_50 : f32 to vector<2x32xf32>
    %133 = arith.mulf %131, %132 : vector<2x32xf32>
    %c0_51 = arith.constant 0 : index
    %c0_52 = arith.constant 0 : index
    %134 = vector.load %arg7[%c0_51, %c0_52] : memref<192x6xf32, #tpu.memory_space<vmem>>, vector<192x6xf32>
    %135 = tpu.concatenate %133, %133, %133, %133, %133, %133 in 1 : vector<2x32xf32>, vector<2x32xf32>, vector<2x32xf32>, vector<2x32xf32>, vector<2x32xf32>, vector<2x32xf32> -> vector<2x192xf32>
    %cst_53 = arith.constant 0.000000e+00 : f32
    %136 = vector.broadcast %cst_53 : f32 to vector<2x1xf32>
    %137 = arith.cmpf oeq, %0, %136 : vector<2x1xf32>
    %138 = vector.extract_strided_slice %15 {offsets = [0, 64], sizes = [2, 192], strides = [1, 1]} : vector<8x768xf32> to vector<2x192xf32>
    %139 = arith.mulf %138, %135 : vector<2x192xf32>
    %cst_54 = arith.constant dense<0.000000e+00> : vector<2x6xf32>
    %140 = tpu.matmul %139, %134, %cst_54 {dimension_numbers = #tpu.dot_dimension_numbers<[1], [0], [0], [1], [0, 0, 1, 1], [], []>} : vector<2x192xf32>, vector<192x6xf32>, vector<2x6xf32> -> vector<2x6xf32>
    %141 = vector.extract_strided_slice %15 {offsets = [2, 64], sizes = [2, 192], strides = [1, 1]} : vector<8x768xf32> to vector<2x192xf32>
    %142 = arith.mulf %141, %135 : vector<2x192xf32>
    %cst_55 = arith.constant dense<0.000000e+00> : vector<2x6xf32>
    %143 = tpu.matmul %142, %134, %cst_55 {dimension_numbers = #tpu.dot_dimension_numbers<[1], [0], [0], [1], [0, 0, 1, 1], [], []>} : vector<2x192xf32>, vector<192x6xf32>, vector<2x6xf32> -> vector<2x6xf32>
    %144 = vector.extract_strided_slice %15 {offsets = [4, 64], sizes = [2, 192], strides = [1, 1]} : vector<8x768xf32> to vector<2x192xf32>
    %145 = arith.mulf %144, %135 : vector<2x192xf32>
    %cst_56 = arith.constant dense<0.000000e+00> : vector<2x6xf32>
    %146 = tpu.matmul %145, %134, %cst_56 {dimension_numbers = #tpu.dot_dimension_numbers<[1], [0], [0], [1], [0, 0, 1, 1], [], []>} : vector<2x192xf32>, vector<192x6xf32>, vector<2x6xf32> -> vector<2x6xf32>
    %147 = vector.extract_strided_slice %15 {offsets = [6, 64], sizes = [2, 192], strides = [1, 1]} : vector<8x768xf32> to vector<2x192xf32>
    %148 = arith.mulf %147, %135 : vector<2x192xf32>
    %cst_57 = arith.constant dense<0.000000e+00> : vector<2x6xf32>
    %149 = tpu.matmul %148, %134, %cst_57 {dimension_numbers = #tpu.dot_dimension_numbers<[1], [0], [0], [1], [0, 0, 1, 1], [], []>} : vector<2x192xf32>, vector<192x6xf32>, vector<2x6xf32> -> vector<2x6xf32>
    %cst_58 = arith.constant 0xFF800000 : f32
    %150 = vector.shape_cast %137 : vector<2x1xi1> to vector<2x1xi1>
    %151 = vector.broadcast %150 : vector<2x1xi1> to vector<2x6xi1>
    %152 = vector.broadcast %cst_58 : f32 to vector<2x6xf32>
    %153 = arith.select %151, %152, %149 : vector<2x6xi1>, vector<2x6xf32>
    %154 = arith.maximumf %140, %143 : vector<2x6xf32>
    %155 = arith.maximumf %146, %153 : vector<2x6xf32>
    %156 = arith.maximumf %154, %155 : vector<2x6xf32>
    %157 = arith.subf %140, %156 : vector<2x6xf32>
    %158 = math.exp %157 : vector<2x6xf32>
    %159 = arith.subf %143, %156 : vector<2x6xf32>
    %160 = math.exp %159 : vector<2x6xf32>
    %161 = arith.subf %146, %156 : vector<2x6xf32>
    %162 = math.exp %161 : vector<2x6xf32>
    %163 = arith.subf %153, %156 : vector<2x6xf32>
    %164 = math.exp %163 : vector<2x6xf32>
    %165 = arith.addf %158, %160 : vector<2x6xf32>
    %166 = arith.addf %165, %162 : vector<2x6xf32>
    %167 = arith.addf %166, %164 : vector<2x6xf32>
    %168 = tpu.reciprocal %167 {approx = true} : vector<2x6xf32> -> vector<2x6xf32>
    %169 = arith.mulf %158, %168 : vector<2x6xf32>
    %c0_59 = arith.constant 0 : index
    %c0_60 = arith.constant 0 : index
    %c0_61 = arith.constant 0 : index
    %170 = vector.load %arg9[%c0_59, %c0_60, %c0_61] : memref<4x2x6xf32, #tpu.memory_space<vmem>>, vector<1x2x6xf32>
    %171 = vector.shape_cast %170 : vector<1x2x6xf32> to vector<2x6xf32>
    %172 = vector.shape_cast %169 : vector<2x6xf32> to vector<1x2x6xf32>
    tpu.vector_store %arg9[%c0_59, %c0_60, %c0_61], %172 {strides = array<i32>} : memref<4x2x6xf32, #tpu.memory_space<vmem>>, vector<1x2x6xf32>,
    %173 = vector.shape_cast %169 : vector<2x6xf32> to vector<2x6x1xf32>
    %174 = vector.shape_cast %18 : vector<2x32xf32> to vector<2x1x32xf32>
    %175 = vector.broadcast %173 : vector<2x6x1xf32> to vector<2x6x32xf32>
    %176 = vector.broadcast %174 : vector<2x1x32xf32> to vector<2x6x32xf32>
    %177 = arith.mulf %175, %176 : vector<2x6x32xf32>
    %178 = arith.mulf %160, %168 : vector<2x6xf32>
    %c1_62 = arith.constant 1 : index
    %c0_63 = arith.constant 0 : index
    %c0_64 = arith.constant 0 : index
    %179 = vector.load %arg9[%c1_62, %c0_63, %c0_64] : memref<4x2x6xf32, #tpu.memory_space<vmem>>, vector<1x2x6xf32>
    %180 = vector.shape_cast %179 : vector<1x2x6xf32> to vector<2x6xf32>
    %181 = vector.shape_cast %178 : vector<2x6xf32> to vector<1x2x6xf32>
    tpu.vector_store %arg9[%c1_62, %c0_63, %c0_64], %181 {strides = array<i32>} : memref<4x2x6xf32, #tpu.memory_space<vmem>>, vector<1x2x6xf32>,
    %182 = vector.shape_cast %178 : vector<2x6xf32> to vector<2x6x1xf32>
    %183 = vector.shape_cast %39 : vector<2x32xf32> to vector<2x1x32xf32>
    %184 = vector.broadcast %182 : vector<2x6x1xf32> to vector<2x6x32xf32>
    %185 = vector.broadcast %183 : vector<2x1x32xf32> to vector<2x6x32xf32>
    %186 = arith.mulf %184, %185 : vector<2x6x32xf32>
    %187 = arith.addf %177, %186 : vector<2x6x32xf32>
    %188 = arith.mulf %162, %168 : vector<2x6xf32>
    %c2_65 = arith.constant 2 : index
    %c0_66 = arith.constant 0 : index
    %c0_67 = arith.constant 0 : index
    %189 = vector.load %arg9[%c2_65, %c0_66, %c0_67] : memref<4x2x6xf32, #tpu.memory_space<vmem>>, vector<1x2x6xf32>
    %190 = vector.shape_cast %189 : vector<1x2x6xf32> to vector<2x6xf32>
    %191 = vector.shape_cast %188 : vector<2x6xf32> to vector<1x2x6xf32>
    tpu.vector_store %arg9[%c2_65, %c0_66, %c0_67], %191 {strides = array<i32>} : memref<4x2x6xf32, #tpu.memory_space<vmem>>, vector<1x2x6xf32>,
    %192 = vector.shape_cast %188 : vector<2x6xf32> to vector<2x6x1xf32>
    %193 = vector.shape_cast %60 : vector<2x32xf32> to vector<2x1x32xf32>
    %194 = vector.broadcast %192 : vector<2x6x1xf32> to vector<2x6x32xf32>
    %195 = vector.broadcast %193 : vector<2x1x32xf32> to vector<2x6x32xf32>
    %196 = arith.mulf %194, %195 : vector<2x6x32xf32>
    %197 = arith.addf %187, %196 : vector<2x6x32xf32>
    %198 = arith.mulf %164, %168 : vector<2x6xf32>
    %c3_68 = arith.constant 3 : index
    %c0_69 = arith.constant 0 : index
    %c0_70 = arith.constant 0 : index
    %199 = vector.load %arg9[%c3_68, %c0_69, %c0_70] : memref<4x2x6xf32, #tpu.memory_space<vmem>>, vector<1x2x6xf32>
    %200 = vector.shape_cast %199 : vector<1x2x6xf32> to vector<2x6xf32>
    %201 = vector.shape_cast %198 : vector<2x6xf32> to vector<1x2x6xf32>
    tpu.vector_store %arg9[%c3_68, %c0_69, %c0_70], %201 {strides = array<i32>} : memref<4x2x6xf32, #tpu.memory_space<vmem>>, vector<1x2x6xf32>,
    %202 = vector.shape_cast %198 : vector<2x6xf32> to vector<2x6x1xf32>
    %203 = vector.shape_cast %81 : vector<2x32xf32> to vector<2x1x32xf32>
    %204 = vector.broadcast %202 : vector<2x6x1xf32> to vector<2x6x32xf32>
    %205 = vector.broadcast %203 : vector<2x1x32xf32> to vector<2x6x32xf32>
    %206 = arith.mulf %204, %205 : vector<2x6x32xf32>
    %207 = arith.addf %197, %206 : vector<2x6x32xf32>
    %c0_71 = arith.constant 0 : index
    %c0_72 = arith.constant 0 : index
    %c0_73 = arith.constant 0 : index
    %208 = vector.load %arg8[%c0_71, %c0_72, %c0_73] : memref<2x6x32xf32, #tpu.memory_space<vmem>>, vector<2x6x32xf32>
    tpu.vector_store %arg8[%c0_71, %c0_72, %c0_73], %207 {strides = array<i32>} : memref<2x6x32xf32, #tpu.memory_space<vmem>>, vector<2x6x32xf32>,
    return
  }
  func.func @transform_0(%arg0: i32) -> (i32, i32, i32) {
    %c0_i32 = arith.constant 0 : i32
    %c0_i32_0 = arith.constant 0 : i32
    %c0_i32_1 = arith.constant 0 : i32
    return %c0_i32, %arg0, %c0_i32_0 : i32, i32, i32
  }
  func.func @transform_1(%arg0: i32) -> (i32, i32) {
    %c0_i32 = arith.constant 0 : i32
    %c0_i32_0 = arith.constant 0 : i32
    return %arg0, %c0_i32 : i32, i32
  }
  func.func @transform_2(%arg0: i32) -> (i32, i32) {
    %c0_i32 = arith.constant 0 : i32
    %c0_i32_0 = arith.constant 0 : i32
    %c0_i32_1 = arith.constant 0 : i32
    return %c0_i32, %c0_i32_0 : i32, i32
  }
  func.func @transform_3(%arg0: i32) -> (i32, i32) {
    %c0_i32 = arith.constant 0 : i32
    %c0_i32_0 = arith.constant 0 : i32
    %c0_i32_1 = arith.constant 0 : i32
    return %c0_i32, %c0_i32_0 : i32, i32
  }
  func.func @transform_4(%arg0: i32) -> (i32, i32, i32) {
    %c0_i32 = arith.constant 0 : i32
    %c0_i32_0 = arith.constant 0 : i32
    %c0_i32_1 = arith.constant 0 : i32
    %c0_i32_2 = arith.constant 0 : i32
    return %c0_i32, %c0_i32_0, %c0_i32_1 : i32, i32, i32
  }
  func.func @transform_5(%arg0: i32) -> (i32, i32, i32) {
    %c0_i32 = arith.constant 0 : i32
    %c0_i32_0 = arith.constant 0 : i32
    %c0_i32_1 = arith.constant 0 : i32
    %c0_i32_2 = arith.constant 0 : i32
    return %c0_i32, %c0_i32_0, %c0_i32_1 : i32, i32, i32
  }
  func.func @transform_6(%arg0: i32) -> (i32, i32) {
    %c0_i32 = arith.constant 0 : i32
    %c0_i32_0 = arith.constant 0 : i32
    %c0_i32_1 = arith.constant 0 : i32
    return %c0_i32, %c0_i32_0 : i32, i32
  }
  func.func @transform_7(%arg0: i32) -> (i32, i32, i32) {
    %c0_i32 = arith.constant 0 : i32
    %c0_i32_0 = arith.constant 0 : i32
    %c0_i32_1 = arith.constant 0 : i32
    return %arg0, %c0_i32, %c0_i32_0 : i32, i32, i32
  }
  func.func @transform_8(%arg0: i32) -> (i32, i32, i32) {
    %c0_i32 = arith.constant 0 : i32
    %c0_i32_0 = arith.constant 0 : i32
    %c0_i32_1 = arith.constant 0 : i32
    return %c0_i32, %arg0, %c0_i32_0 : i32, i32, i32
  }
  func.func @transform_9(%arg0: i32) -> (i32, i32) {
    %c0_i32 = arith.constant 0 : i32
    %c0_i32_0 = arith.constant 0 : i32
    return %arg0, %c0_i32 : i32, i32
  }
}

</mosaic_0001>

<bundles_post_ra>
// kernel: tpu_custom_call.1
= control target key start
LH: loop header
LB: loop body
LE: loop exit
PB: predicated region body
PF: predicated region fallthrough
CT: control target
= control target key end

     0   :  { %15 = vsyncpa [#allocation3], 0  ;;  %vm69_vm0 = vcmask 1041408   ;;  %vm71_vm1 = vcmask 1043456   ;;  %vm73_vm2 = vcmask 1045504   ;;  %vm89_vm3 = vcmask 261120   ;;  %s1480_s0 = inlined_call_operand.vmem [shape: f32[4,2,32], index: 0, kind: input, shape index: {}]   ;;  %s1481_s1 = inlined_call_operand.vmem [shape: f32[2,1], index: 1, kind: input, shape index: {}]   ;;  %s1482_s2 = inlined_call_operand.vmem [shape: f32[32,768], index: 2, kind: input, shape index: {}]   ;;  %s1483_s3 = inlined_call_operand.vmem [shape: f32[1,768], index: 3, kind: input, shape index: {}]   ;;  %s1484_s4 = inlined_call_operand.vmem [shape: f32[4,1,128], index: 4, kind: input, shape index: {}]   ;;  %s1485_s5 = inlined_call_operand.vmem [shape: f32[4,1,1], index: 5, kind: input, shape index: {}]   ;;  %s1486_s6 = inlined_call_operand.vmem [shape: f32[192,6], index: 6, kind: input, shape index: {}]   ;;  %s1487_s7 = inlined_call_operand.vmem [shape: f32[2,6,32], index: 7, kind: output, shape index: {0}]   ;;  %s1488_s8 = inlined_call_operand.hbm [shape: f32[4,2,6], index: 8, kind: output, shape index: {1}]   ;;  %s1489_s9 = inlined_call_operand.hbm [shape: f32[2,4], index: 9, kind: output, shape index: {2}]  }
   0x1   :  { %v50_v0 = vld [vmem:[%s1482_s2 + $0x90] sm:$0xff]  ;;  %v51_v1 = vld [vmem:[%s1482_s2 + $0x98] sm:$0xff]  ;;  %v53_v2 = vld [vmem:[%s1482_s2 + $0xa8] sm:$0xff] }
   0x2   :  { %105 = vmatpush.msra.mxu0 %v50_v0  ;;  %125 = vmatpush.msra.mxu1 %v51_v1  ;;  %v44_v3 = vld [vmem:[%s1482_s2 + $0x60] sm:$0xff]  ;;  %v45_v4 = vld [vmem:[%s1482_s2 + $0x68] sm:$0xff]  ;;  %v47_v5 = vld [vmem:[%s1482_s2 + $0x78] sm:$0xff] }
   0x3   :  { %165 = vmatpush.msra.mxu3 %v53_v2  ;;  %v38_v6 = vld [vmem:[%s1482_s2 + $0x30] sm:$0xff]  ;;  %v39_v7 = vld [vmem:[%s1482_s2 + $0x38] sm:$0xff]  ;;  %v41_v8 = vld [vmem:[%s1482_s2 + $0x48] sm:$0xff] }
   0x4   :  { %106 = vmatpush.msra.mxu0 %v44_v3  ;;  %126 = vmatpush.msra.mxu1 %v45_v4  ;;  %v32_v9 = vld [vmem:[%s1482_s2] sm:$0xff]  ;;  %v33_v10 = vld [vmem:[%s1482_s2 + $0x8] sm:$0xff]  ;;  %v35_v14 = vld [vmem:[%s1482_s2 + $0x18] sm:$0xff] }
   0x5   :  { %166 = vmatpush.msra.mxu3 %v47_v5  ;;  %v56_v11 = vld [vmem:[%s1480_s0] sm:$0x3]  ;;  %v57_v12 = vld [vmem:[%s1480_s0 + $0x2] sm:$0x3]  ;;  %v58_v13 = vld [vmem:[%s1480_s0 + $0x4] sm:$0x3] }
   0x6   :  { %107 = vmatpush.msra.mxu0 %v38_v6  ;;  %127 = vmatpush.msra.mxu1 %v39_v7  ;;  %v59_v15 = vld [vmem:[%s1480_s0 + $0x6] sm:$0x3]  ;;  %v61_v16 = vrot.slane %v57_v12, 6  ;;  %v64_v17 = vrot.slane %v58_v13, 4  ;;  %v54_v20 = vld [vmem:[%s1482_s2 + $0xb0] sm:$0xff] }
   0x7   :  { %v52_v18 = vld [vmem:[%s1482_s2 + $0xa0] sm:$0xff]  ;;  %167 = vmatpush.msra.mxu3 %v41_v8  ;;  %v67_v19 = vrot.slane %v59_v15, 2  ;;  %v46_v23 = vld [vmem:[%s1482_s2 + $0x70] sm:$0xff] }
   0x8   :  { %108 = vmatpush.msra.mxu0 %v32_v9  ;;  %128 = vmatpush.msra.mxu1 %v33_v10  ;;  %v70_v21 = vsel %vm69_vm0, %v56_v11, %v61_v16  ;;  %v48_v24 = vld [vmem:[%s1482_s2 + $0x80] sm:$0xff]  ;;  %v42_v27 = vld [vmem:[%s1482_s2 + $0x50] sm:$0xff] }
   0x9   :  { %168 = vmatpush.msra.mxu3 %v35_v14  ;;  %v72_v22 = vsel %vm71_vm1, %v70_v21, %v64_v17  ;;  %v40_v26 = vld [vmem:[%s1482_s2 + $0x40] sm:$0xff]  ;;  %v34_v28 = vld [vmem:[%s1482_s2 + $0x10] sm:$0xff] }
   0xa   :  { %145 = vmatpush.msrb.mxu1 %v52_v18  ;;  %v74_v25 = vsel %vm73_vm2, %v72_v22, %v67_v19  ;;  %185 = vmatpush.msrb.mxu0 %v54_v20 }
   0xb   :  { %913 = vmatmul.msk.f32.vlgmr.msra.gmra.mxu0 %vm89_vm3, %v74_v25  ;;  %914 = vmatmul.msk.f32.vlgmr.msra.gmra.mxu1 %vm89_vm3, %v74_v25 }
   0xc   :  { %916 = vmatmul.msk.f32.vlgmr.msra.gmra.mxu3 %vm89_vm3, %v74_v25  ;;  %146 = vmatpush.msrb.mxu1 %v46_v23 }
   0xd   :  { %186 = vmatpush.msrb.mxu0 %v48_v24 }
   0xe   :  { %16 = vsyncpa [#allocation5], 0  ;;  %147 = vmatpush.msrb.mxu1 %v40_v26  ;;  %v36_v29 = vld [vmem:[%s1482_s2 + $0x20] sm:$0xff]  ;;  %v55_v30 = vld [vmem:[%s1482_s2 + $0xb8] sm:$0xff]  ;;  %vm253_vm4 = vcmask 1043458   ;;  %vm289_vm5 = vcmask 1045508  }
   0xf   :  { %187 = vmatpush.msrb.mxu0 %v42_v27  ;;  %v49_v31 = vld [vmem:[%s1482_s2 + $0x88] sm:$0xff]  ;;  %v43_v32 = vld [vmem:[%s1482_s2 + $0x58] sm:$0xff]  ;;  %v1198_v34 = vld [vmem:[%s1483_s3] sm:$0x3f]  ;;  %vm325_vm6 = vcmask 1047558   ;;  %v1044_v12 = vmov 0  }
  0x10   :  { %148 = vmatpush.msrb.mxu1 %v34_v28  ;;  %v37_v33 = vld [vmem:[%s1482_s2 + $0x28] sm:$0xff]  ;;  %v77_v35 = vperm.slane %v1198_v34, 0  ;;  %v80_v39 = vperm.slane %v1198_v34, 3  ;;  %v81_v40 = vperm.slane %v1198_v34, 4  ;;  %v79_v41 = vperm.slane %v1198_v34, 2  ;;  %942 = vset.pattern.permute.xlu2 %v1044_v12  ;;  %s1046_s16 = smov 32  }
  0x11   :  { %188 = vmatpush.msrb.mxu0 %v36_v29  ;;  %v958_v46 = vld [vmem:[%s1484_s4 + $0x1] ss:$0 sm:$0xff]  ;;  %v959_v48 = vld [vmem:[%s1484_s4 + $0x2] ss:$0 sm:$0xff]  ;;  %v82_v55 = vperm.slane %v1198_v34, 5  ;;  %943 = vset.pattern.permute.xlu0 %v1044_v12  ;;  %s1047_s17 = smov 64  }
  0x12   :  { %205 = vmatpush.msra.mxu1 %v55_v30  ;;  %v960_v59 = vld [vmem:[%s1484_s4] ss:$0 sm:$0xff]  ;;  %v961_v63 = vld [vmem:[%s1484_s4 + $0x3] ss:$0 sm:$0xff]  ;;  %v962_v7 = vld [vmem:[%s1485_s5 + $0x1] ss:$0 sm:$0xff]  ;;  %944 = vset.pattern.permute.xlu1 %v1044_v12 }
  0x13   :  { %915 = vmatmul.msk.f32.vlgmr.msrb.gmra.mxu1 %vm89_vm3, %v74_v25  ;;  %917 = vmatmul.msk.f32.vlgmr.msrb.gmra.mxu0 %vm89_vm3, %v74_v25  ;;  %v963_v8 = vld [vmem:[%s1485_s5 + $0x2] ss:$0 sm:$0xff]  ;;  %v964_v16 = vld [vmem:[%s1485_s5] ss:$0 sm:$0xff]  ;;  %v965_v17 = vld [vmem:[%s1485_s5 + $0x3] ss:$0 sm:$0xff] }
  0x14   :  { %206 = vmatpush.msra.mxu1 %v49_v31  ;;  %s1049_s15 = smov 2   ;;  %s883_s20 = sshll.u32 %s1488_s8, 4  ;;  %s884_s20 = int_to_ptr.hbm [resolvable:$true] %s883_s20 }
  0x15   :  { %s1051_s21 = smov [#allocation2]   ;;  %s1052_s8 = smov [#allocation4]  }
  0x16   :  { %207 = vmatpush.msra.mxu1 %v43_v32  ;;  %s881_s22 = sshll.u32 %s1051_s21, 4  ;;  %s897_s3 = sshll.u32 %s1489_s9, 4  ;;  %s882_s22 = int_to_ptr.vmem [resolvable:$true] %s881_s22  ;;  %s898_s3 = int_to_ptr.hbm [resolvable:$true] %s897_s3 }
  0x18   :  { %208 = vmatpush.msra.mxu1 %v37_v33 }
  0x1b   :  { %918 = vmatmul.msk.f32.vlgmr.msra.gmra.mxu1 %vm89_vm3, %v74_v25 }
  0x88   :  { %v110_v36 = vpop.f32.mrf.mxu0  ;;  %v1201_v37 = vpop.f32.mrf.mxu1 }
  0x89   :  { %v1203_v38 = vadd.f32 %v110_v36, %v77_v35 }
  0x8b   :  { %791 = vst [vmem:[#allocation1] sm:$0xff] %v1203_v38 }
  0x8f   :  { %v170_v42 = vpop.f32.mrf.mxu3 }
  0x90   :  { %v171_v43 = vadd.f32 %v170_v42, %v80_v39  ;;  %v150_v44 = vpop.f32.mrf.mxu1  ;;  %v190_v45 = vpop.f32.mrf.mxu0 }
  0x91   :  { %v191_v47 = vadd.f32 %v190_v45, %v81_v40  ;;  %v151_v50 = vadd.f32 %v150_v44, %v79_v41 }
  0x92   :  { %v246_v49 = vmax.f32 %v171_v43, 0.0  ;;  %v1215_v51 = vld [vmem:[#allocation1 + $0x2] ss:$9 sm:$0xff] }
  0x93   :  { %v1217_v52 = vld [vmem:[#allocation1 + $0x3] ss:$9 sm:$0xff]  ;;  %v282_v53 = vmax.f32 %v191_v47, 0.0  ;;  %v213_v57 = vmax.f32 %v151_v50, 0.0 }
  0x94   :  { %821 = vst [vmem:[#allocation1] sm:$0xff] %v1203_v38  ;;  %v252_v54 = vmul.f32 %v958_v46, %v246_v49 }
  0x95   :  { %v288_v56 = vmul.f32 %v959_v48, %v282_v53  ;;  %v218_v0 = vmul.f32 %v960_v59, %v213_v57 }
  0x96   :  { %v254_v58 = vsel %vm253_vm4, %v252_v54, 0.0 }
  0x97   :  { %255 = vadd.xlane.f32.xlu0 %v254_v58  ;;  %v290_v60 = vsel %vm289_vm5, %v288_v56, 0.0  ;;  %v219_v5 = vsel %vm69_vm0, %v218_v0, 0.0 }
  0x98   :  { %v210_v61 = vpop.f32.mrf.mxu1  ;;  %291 = vadd.xlane.f32.xlu1 %v290_v60 }
  0x99   :  { %v211_v62 = vadd.f32 %v210_v61, %v82_v55 }
  0x9b   :  { %v1227_v1 = vld [vmem:[#allocation1 + $0x4] ss:$9 sm:$0xff]  ;;  %v318_v3 = vmax.f32 %v211_v62, 0.0 }
  0x9c   :  { %v1229_v2 = vld [vmem:[#allocation1 + $0x5] ss:$9 sm:$0xff] }
  0x9d   :  { %851 = vst [vmem:[#allocation1] sm:$0xff] %v1203_v38  ;;  %v324_v4 = vmul.f32 %v961_v63, %v318_v3 }
  0x9f   :  { %220 = vadd.xlane.f32.xlu0 %v219_v5  ;;  %v326_v6 = vsel %vm325_vm6, %v324_v4, 0.0 }
  0xa0   :  { %327 = vadd.xlane.f32.xlu1 %v326_v6 }
 0x10a   :  { %v256_v9 = vpop.xlane.xlu0 %255 }
 0x10b   :  { %v262_v10 = vadd.f32 %v962_v7, %v256_v9  ;;  %v292_v11 = vpop.xlane.xlu1 %291 }
 0x10c   :  { %v298_v13 = vadd.f32 %v963_v8, %v292_v11 }
 0x10d   :  { %v922_v14 = vmul.f32 -1.442695, %v262_v10 }
 0x10e   :  { %v925_v15 = vmul.f32 -1.442695, %v298_v13 }
 0x10f   :  { %966 = vpow2.f32 %v922_v14 }
 0x110   :  { %968 = vpow2.f32 %v925_v15 }
 0x112   :  { %v221_v18 = vpop.xlane.xlu0 %220 }
 0x113   :  { %v226_v19 = vadd.f32 %v964_v16, %v221_v18  ;;  %v328_v20 = vpop.xlane.xlu1 %327 }
 0x114   :  { %v334_v21 = vadd.f32 %v965_v17, %v328_v20  ;;  %v1263_v20 = vld [vmem:[%s1481_s1] sm:$0x3]  ;;  %s1045_s1 = smov 96  }
 0x115   :  { %v967_v22 = vpop.eup %966  ;;  %v919_v23 = vmul.f32 -1.442695, %v226_v19 }
 0x116   :  { %v969_v24 = vpop.eup %968  ;;  %v266_v25 = vadd.f32 1.0, %v967_v22  ;;  %v928_v26 = vmul.f32 -1.442695, %v334_v21  ;;  %v424_v21 = vsub.f32 1.0, %v1263_v20 }
 0x117   :  { %v302_v27 = vadd.f32 1.0, %v969_v24  ;;  %970 = vpow2.f32 %v919_v23 }
 0x118   :  { %972 = vrcp.f32 %v266_v25  ;;  %vm272_vm7 = vweird.f32 %v266_v25  ;;  %v278_v36 = vand.u32 2147483648, %v266_v25  ;;  %v276_v41 = vand.u32 2147483647, %v266_v25 }
 0x119   :  { %974 = vrcp.f32 %v302_v27  ;;  %v314_v44 = vand.u32 2147483648, %v302_v27  ;;  %v312_v47 = vand.u32 2147483647, %v302_v27  ;;  %vm308_vm12 = vweird.f32 %v302_v27 }
 0x11a   :  { %976 = vpow2.f32 %v928_v26  ;;  %v279_v45 = vor.u32 1.1754944e-38, %v278_v36  ;;  %vm277_vm11 = vcmp.eq.f32.partialorder %v276_v41, 8.507059e+37 }
 0x11b   :  { %v315_v55 = vor.u32 1.1754944e-38, %v314_v44  ;;  %vm313_vm14 = vcmp.eq.f32.partialorder %v312_v47, 8.507059e+37 }
 0x11d   :  { %v971_v28 = vpop.eup %970 }
 0x11e   :  { %v973_v29 = vpop.eup %972  ;;  %v230_v30 = vadd.f32 1.0, %v971_v28 }
 0x11f   :  { %v975_v31 = vpop.eup %974  ;;  %v268_v32 = vmul.f32 %v973_v29, %v266_v25  ;;  %vm273_vm8 = vweird.f32 %v973_v29 }
 0x120   :  { %v977_v33 = vpop.eup %976  ;;  %v304_v35 = vmul.f32 %v975_v31, %v302_v27  ;;  %978 = vrcp.f32 %v230_v30  ;;  %vm274_vm9 = vmor %vm272_vm7, %vm273_vm8  ;;  %vm309_vm10 = vweird.f32 %v975_v31  ;;  %v242_v0 = vand.u32 2147483648, %v230_v30 }
 0x121   :  { %v338_v39 = vadd.f32 1.0, %v977_v33  ;;  %v269_v40 = vsub.f32 1.0, %v268_v32  ;;  %vm310_vm13 = vmor %vm308_vm12, %vm309_vm10  ;;  %v240_v4 = vand.u32 2147483647, %v230_v30  ;;  %vm236_vm0 = vweird.f32 %v230_v30 }
 0x122   :  { %v305_v42 = vsub.f32 1.0, %v304_v35  ;;  %v243_v8 = vor.u32 1.1754944e-38, %v242_v0  ;;  %vm469_vm8 = vcmask 523264   ;;  %vm369_vm12 = vcmask 7168  }
 0x123   :  { %980 = vrcp.f32 %v338_v39  ;;  %v270_v43 = vmul.f32 %v973_v29, %v269_v40  ;;  %v350_v7 = vand.u32 2147483648, %v338_v39  ;;  %v348_v10 = vand.u32 2147483647, %v338_v39 }
 0x124   :  { %v306_v46 = vmul.f32 %v975_v31, %v305_v42  ;;  %vm241_vm4 = vcmp.eq.f32.partialorder %v240_v4, 8.507059e+37  ;;  %vm344_vm5 = vweird.f32 %v338_v39 }
 0x125   :  { %v271_v48 = vadd.f32 %v973_v29, %v270_v43  ;;  %v351_v16 = vor.u32 1.1754944e-38, %v350_v7  ;;  %vm349_vm7 = vcmp.eq.f32.partialorder %v348_v10, 8.507059e+37  ;;  %v1291_v7 = vld [vmem:[%s1486_s6 + $0xb8] sm:$0xff] }
 0x126   :  { %v979_v49 = vpop.eup %978  ;;  %v307_v50 = vadd.f32 %v975_v31, %v306_v46  ;;  %523 = vmatpush.msrb.mxu3 %v1291_v7  ;;  %586 = vmatpush.msrb.mxu1 %v1291_v7  ;;  %v1317_v10 = vld [vmem:[%s1486_s6 + $0x98] sm:$0xff] }
 0x127   :  { %v232_v53 = vmul.f32 %v979_v49, %v230_v30  ;;  %v275_v54 = vsel %vm274_vm9, %v973_v29, %v271_v48  ;;  %vm237_vm15 = vweird.f32 %v979_v49  ;;  %vm471_vm9 = vcmask 785408  }
 0x128   :  { %v1248_v56 = vsel %vm277_vm11, %v279_v45, %v275_v54  ;;  %v311_v57 = vsel %vm310_vm13, %v975_v31, %v307_v50  ;;  %vm238_vm1 = vmor %vm236_vm0, %vm237_vm15  ;;  %vm750_vm11 = vcmask 41984   ;;  %vm371_vm13 = vcmask 15360  }
 0x129   :  { %v981_v58 = vpop.eup %980  ;;  %v384_v59 = vsub.f32 1.0, %v1248_v56  ;;  %v1251_v60 = vsel %vm313_vm14, %v315_v55, %v311_v57  ;;  %v233_v61 = vsub.f32 1.0, %v232_v53  ;;  %vm373_vm14 = vcmask 23552  }
 0x12a   :  { %v340_v62 = vmul.f32 %v981_v58, %v338_v39  ;;  %v391_v63 = vsub.f32 1.0, %v1251_v60  ;;  %vm345_vm2 = vweird.f32 %v981_v58  ;;  %vm375_vm15 = vcmask 25600  }
 0x12b   :  { %387 = vperm.xlu2 %942, %v384_v59   ;;  %v234_v3 = vmul.f32 %v979_v49, %v233_v61  ;;  %vm346_vm6 = vmor %vm344_vm5, %vm345_vm2  ;;  %vm872_vm0 = vcmask 259072  }
 0x12c   :  { %394 = vperm.xlu0 %943, %v391_v63   ;;  %v341_v5 = vsub.f32 1.0, %v340_v62  ;;  %v78_v63 = vperm.slane %v1198_v34, 1  ;;  %v1303_v34 = vld [vmem:[%s1486_s6 + $0xa8] sm:$0xff] }
 0x12d   :  { %v235_v6 = vadd.f32 %v979_v49, %v234_v3 }
 0x12e   :  { %v342_v9 = vmul.f32 %v981_v58, %v341_v5  ;;  %v131_v0 = vadd.f32 %v1201_v37, %v78_v63 }
 0x12f   :  { %v239_v11 = vsel %vm238_vm1, %v979_v49, %v235_v6 }
 0x130   :  { %v1254_v13 = vsel %vm241_vm4, %v243_v8, %v239_v11  ;;  %v343_v14 = vadd.f32 %v981_v58, %v342_v9  ;;  %v1296_v8 = vld [vmem:[%s1486_s6 + $0xb0] sm:$0xff]  ;;  %v1310_v9 = vld [vmem:[%s1486_s6 + $0xa0] sm:$0xff] }
 0x131   :  { %v377_v15 = vsub.f32 1.0, %v1254_v13  ;;  %524 = vmatpush.msrb.mxu3 %v1296_v8  ;;  %587 = vmatpush.msrb.mxu1 %v1296_v8  ;;  %v1324_v11 = vld [vmem:[%s1486_s6 + $0x90] sm:$0xff] }
 0x132   :  { %v347_v17 = vsel %vm346_vm6, %v981_v58, %v343_v14 }
 0x133   :  { %380 = vperm.xlu2 %942, %v377_v15   ;;  %v1257_v18 = vsel %vm349_vm7, %v351_v16, %v347_v17  ;;  %525 = vmatpush.msrb.mxu3 %v1303_v34 }
 0x134   :  { %v398_v19 = vsub.f32 1.0, %v1257_v18  ;;  %588 = vmatpush.msrb.mxu1 %v1303_v34 }
 0x135   :  { %526 = vmatpush.msrb.mxu3 %v1310_v9 }
 0x136   :  { %401 = vperm.xlu1 %944, %v398_v19   ;;  %589 = vmatpush.msrb.mxu1 %v1310_v9  ;;  %v1333_v19 = vld [vmem:[%s1486_s6 + $0x88] sm:$0xff] }
 0x137   :  { %527 = vmatpush.msrb.mxu3 %v1317_v10 }
 0x138   :  { %590 = vmatpush.msrb.mxu1 %v1317_v10 }
 0x139   :  { %528 = vmatpush.msrb.mxu3 %v1324_v11 }
 0x13a   :  { %591 = vmatpush.msrb.mxu1 %v1324_v11 }
 0x13b   :  { %420 = vperm.xlu2 %942, %v1263_v20   ;;  %529 = vmatpush.msrb.mxu3 %v1333_v19 }
 0x13c   :  { %592 = vmatpush.msrb.mxu1 %v1333_v19 }
 0x143   :  { %428 = vperm.xlu2 %942, %v424_v21  }
 0x185   :  { %v388_v22 = vpop.permute.xlu2 %387 }
 0x186   :  { %v390_v25 = vmul.f32 %v388_v22, %v1203_v38 }
 0x188   :  { %v406_v28 = vrot.slane %v390_v25, 2 }
 0x18d   :  { %v381_v23 = vpop.permute.xlu2 %380 }
 0x18e   :  { %v383_v27 = vmul.f32 %v381_v23, %v1203_v38 }
 0x190   :  { %v408_v31 = vadd.f32 %v406_v28, %v383_v27 }
 0x195   :  { %v421_v30 = vpop.permute.xlu2 %420 }
 0x19d   :  { %v429_v42 = vpop.permute.xlu2 %428 }
 0x19e   :  { %v395_v24 = vpop.permute.xlu0 %394 }
 0x19f   :  { %v397_v26 = vmul.f32 %v395_v24, %v1203_v38  ;;  %v1341_v24 = vld [vmem:[%s1486_s6 + $0x80] sm:$0xff] }
 0x1a0   :  { %530 = vmatpush.msrb.mxu3 %v1341_v24  ;;  %593 = vmatpush.msrb.mxu1 %v1341_v24 }
 0x1a1   :  { %v410_v29 = vrot.slane %v397_v26, 4 }
 0x1a2   :  { %649 = vmatpush.msra.mxu1 %v1291_v7 }
 0x1a3   :  { %v412_v33 = vadd.f32 %v410_v29, %v408_v31 }
 0x1a4   :  { %650 = vmatpush.msra.mxu1 %v1296_v8 }
 0x1a5   :  { %v425_v39 = vmul.f32 0.33333334, %v412_v33 }
 0x1a6   :  { %651 = vmatpush.msra.mxu1 %v1303_v34 }
 0x1a7   :  { %v431_v43 = vmul.f32 %v429_v42, %v425_v39 }
 0x1a8   :  { %v402_v32 = vpop.permute.xlu1 %401  ;;  %652 = vmatpush.msra.mxu1 %v1310_v9 }
 0x1a9   :  { %v404_v35 = vmul.f32 %v402_v32, %v1203_v38 }
 0x1aa   :  { %653 = vmatpush.msra.mxu1 %v1317_v10 }
 0x1ab   :  { %v414_v36 = vrot.slane %v404_v35, 6 }
 0x1ac   :  { %654 = vmatpush.msra.mxu1 %v1324_v11 }
 0x1ad   :  { %v416_v40 = vadd.f32 %v414_v36, %v412_v33 }
 0x1ae   :  { %655 = vmatpush.msra.mxu1 %v1333_v19 }
 0x1af   :  { %v417_v41 = vmul.f32 0.25, %v416_v40 }
 0x1b0   :  { %656 = vmatpush.msra.mxu1 %v1341_v24 }
 0x1b1   :  { %v423_v44 = vmul.f32 %v421_v30, %v417_v41 }
 0x1b3   :  { %v432_v45 = vadd.f32 %v431_v43, %v423_v44 }
 0x1b5   :  { %v433_v46 = vmul.f32 0.17677669, %v432_v45  ;;  %v1369_v45 = vld [vmem:[%s1486_s6 + $0x78] sm:$0xff] }
 0x1b6   :  { %495 = vmatpush.msra.mxu2 %v1369_v45  ;;  %558 = vmatpush.msra.mxu0 %v1369_v45 }
 0x1b7   :  { %465 = vrot.lane.b32.xlu1 %v433_v46, %s1045_s1  ;;  %459 = vrot.lane.b32.xlu2 %v433_v46, %s1046_s16 }
 0x1b8   :  { %621 = vmatpush.msra.mxu3 %v1369_v45 }
 0x1bf   :  { %462 = vrot.lane.b32.xlu2 %v433_v46, %s1047_s17 }
 0x211   :  { %v460_v47 = vpop.permute.xlu2 %459 }
 0x212   :  { %v468_v48 = vsel %vm89_vm3, %v433_v46, %v460_v47  ;;  %vm473_vm3 = vcmp.eq.f32.partialorder %v1263_v20, 0.0  ;;  %v1374_v20 = vld [vmem:[%s1486_s6 + $0x70] sm:$0xff]  ;;  %v1389_v46 = vld [vmem:[%s1486_s6 + $0x60] sm:$0xff]  ;;  %v445_v47 = vld [vmem:[%s1486_s6 + $0x58] sm:$0xff] }
 0x213   :  { %478 = vrot.lane.b32.xlu1 %v468_v48, %s1047_s17  ;;  %v536_v58 = vrot.slane %v468_v48, 6  ;;  %v599_v59 = vrot.slane %v468_v48, 4  ;;  %v662_v61 = vrot.slane %v468_v48, 2  ;;  %v724_v44 = vsel %vm473_vm3, 1, %v1044_v12  ;;  %v1381_v12 = vld [vmem:[%s1486_s6 + $0x68] sm:$0xff]  ;;  %496 = vmatpush.msra.mxu2 %v1374_v20 }
 0x214   :  { %559 = vmatpush.msra.mxu0 %v1374_v20  ;;  %622 = vmatpush.msra.mxu3 %v1374_v20 }
 0x215   :  { %497 = vmatpush.msra.mxu2 %v1381_v12 }
 0x216   :  { %560 = vmatpush.msra.mxu0 %v1381_v12  ;;  %623 = vmatpush.msra.mxu3 %v1381_v12 }
 0x217   :  { %498 = vmatpush.msra.mxu2 %v1389_v46 }
 0x218   :  { %561 = vmatpush.msra.mxu0 %v1389_v46  ;;  %624 = vmatpush.msra.mxu3 %v1389_v46 }
 0x219   :  { %v463_v49 = vpop.permute.xlu2 %462  ;;  %499 = vmatpush.msra.mxu2 %v445_v47 }
 0x21a   :  { %v470_v50 = vsel %vm469_vm8, %v468_v48, %v463_v49  ;;  %v444_v48 = vld [vmem:[%s1486_s6 + $0x50] sm:$0xff]  ;;  %562 = vmatpush.msra.mxu0 %v445_v47  ;;  %v443_v49 = vld [vmem:[%s1486_s6 + $0x48] sm:$0xff]  ;;  %625 = vmatpush.msra.mxu3 %v445_v47 }
 0x21b   :  { %500 = vmatpush.msra.mxu2 %v444_v48 }
 0x21c   :  { %563 = vmatpush.msra.mxu0 %v444_v48  ;;  %626 = vmatpush.msra.mxu3 %v444_v48 }
 0x21d   :  { %501 = vmatpush.msra.mxu2 %v443_v49 }
 0x21e   :  { %564 = vmatpush.msra.mxu0 %v443_v49  ;;  %627 = vmatpush.msra.mxu3 %v443_v49 }
 0x229   :  { %v466_v53 = vpop.permute.xlu1 %465 }
 0x22a   :  { %v472_v54 = vsel %vm471_vm9, %v470_v50, %v466_v53  ;;  %v442_v50 = vld [vmem:[%s1486_s6 + $0x40] sm:$0xff]  ;;  %v441_v53 = vld [vmem:[%s1486_s6 + $0x38] sm:$0xff] }
 0x22b   :  { %476 = vrot.lane.b32.xlu2 %v472_v54, %s1047_s17  ;;  %v661_v55 = vrot.slane %v472_v54, 2  ;;  %v535_v57 = vrot.slane %v472_v54, 6  ;;  %v598_v62 = vrot.slane %v472_v54, 4  ;;  %502 = vmatpush.msra.mxu2 %v442_v50  ;;  %v440_v54 = vld [vmem:[%s1486_s6 + $0x30] sm:$0xff] }
 0x22c   :  { %565 = vmatpush.msra.mxu0 %v442_v50  ;;  %628 = vmatpush.msra.mxu3 %v442_v50 }
 0x22d   :  { %663 = vrot.lane.b32.xlu1 %v661_v55, %s1047_s17  ;;  %537 = vrot.lane.b32.xlu0 %v535_v57, %s1047_s17  ;;  %v439_v55 = vld [vmem:[%s1486_s6 + $0x28] sm:$0xff]  ;;  %v438_v57 = vld [vmem:[%s1486_s6 + $0x20] sm:$0xff] }
 0x22e   :  { %503 = vmatpush.msra.mxu2 %v441_v53  ;;  %566 = vmatpush.msra.mxu0 %v441_v53 }
 0x22f   :  { %629 = vmatpush.msra.mxu3 %v441_v53 }
 0x230   :  { %504 = vmatpush.msra.mxu2 %v440_v54  ;;  %567 = vmatpush.msra.mxu0 %v440_v54 }
 0x231   :  { %630 = vmatpush.msra.mxu3 %v440_v54 }
 0x232   :  { %505 = vmatpush.msra.mxu2 %v439_v55  ;;  %568 = vmatpush.msra.mxu0 %v439_v55 }
 0x233   :  { %539 = vrot.lane.b32.xlu2 %v536_v58, %s1047_s17  ;;  %v437_v58 = vld [vmem:[%s1486_s6 + $0x18] sm:$0xff]  ;;  %631 = vmatpush.msra.mxu3 %v439_v55 }
 0x234   :  { %506 = vmatpush.msra.mxu2 %v438_v57  ;;  %569 = vmatpush.msra.mxu0 %v438_v57 }
 0x235   :  { %602 = vrot.lane.b32.xlu1 %v599_v59, %s1047_s17  ;;  %665 = vrot.lane.b32.xlu0 %v662_v61, %s1047_s17  ;;  %v436_v59 = vld [vmem:[%s1486_s6 + $0x10] sm:$0xff]  ;;  %v435_v61 = vld [vmem:[%s1486_s6 + $0x8] sm:$0xff] }
 0x236   :  { %632 = vmatpush.msra.mxu3 %v438_v57  ;;  %507 = vmatpush.msra.mxu2 %v437_v58 }
 0x237   :  { %570 = vmatpush.msra.mxu0 %v437_v58 }
 0x238   :  { %633 = vmatpush.msra.mxu3 %v437_v58  ;;  %508 = vmatpush.msra.mxu2 %v436_v59 }
 0x239   :  { %571 = vmatpush.msra.mxu0 %v436_v59 }
 0x23a   :  { %634 = vmatpush.msra.mxu3 %v436_v59  ;;  %509 = vmatpush.msra.mxu2 %v435_v61 }
 0x23b   :  { %600 = vrot.lane.b32.xlu2 %v598_v62, %s1047_s17  ;;  %v434_v62 = vld [vmem:[%s1486_s6] sm:$0xff]  ;;  %572 = vmatpush.msra.mxu0 %v435_v61  ;;  %s1048_s6 = smov 3  }
 0x23c   :  { %635 = vmatpush.msra.mxu3 %v435_v61  ;;  %510 = vmatpush.msra.mxu2 %v434_v62 }
 0x23d   :  { %573 = vmatpush.msra.mxu0 %v434_v62 }
 0x23e   :  { %684 = vmatpush.msrb.mxu2 %v1369_v45  ;;  %636 = vmatpush.msra.mxu3 %v434_v62 }
 0x23f   :  { %712 = vmatpush.msrb.mxu0 %v1291_v7 }
 0x240   :  { %685 = vmatpush.msrb.mxu2 %v1374_v20 }
 0x241   :  { %713 = vmatpush.msrb.mxu0 %v1296_v8 }
 0x242   :  { %686 = vmatpush.msrb.mxu2 %v1381_v12 }
 0x243   :  { %714 = vmatpush.msrb.mxu0 %v1303_v34 }
 0x244   :  { %687 = vmatpush.msrb.mxu2 %v1389_v46 }
 0x245   :  { %715 = vmatpush.msrb.mxu0 %v1310_v9 }
 0x246   :  { %688 = vmatpush.msrb.mxu2 %v445_v47 }
 0x247   :  { %716 = vmatpush.msrb.mxu0 %v1317_v10 }
 0x248   :  { %689 = vmatpush.msrb.mxu2 %v444_v48 }
 0x249   :  { %717 = vmatpush.msrb.mxu0 %v1324_v11 }
 0x24a   :  { %690 = vmatpush.msrb.mxu2 %v443_v49 }
 0x24b   :  { %718 = vmatpush.msrb.mxu0 %v1333_v19 }
 0x24c   :  { %691 = vmatpush.msrb.mxu2 %v442_v50 }
 0x24d   :  { %719 = vmatpush.msrb.mxu0 %v1341_v24 }
 0x24e   :  { %692 = vmatpush.msrb.mxu2 %v441_v53 }
 0x250   :  { %693 = vmatpush.msrb.mxu2 %v440_v54 }
 0x252   :  { %694 = vmatpush.msrb.mxu2 %v439_v55 }
 0x254   :  { %695 = vmatpush.msrb.mxu2 %v438_v57 }
 0x256   :  { %696 = vmatpush.msrb.mxu2 %v437_v58 }
 0x258   :  { %697 = vmatpush.msrb.mxu2 %v436_v59 }
 0x25a   :  { %698 = vmatpush.msrb.mxu2 %v435_v61 }
 0x25c   :  { %699 = vmatpush.msrb.mxu2 %v434_v62 }
 0x285   :  { %v479_v3 = vpop.permute.xlu1 %478  ;;  %v477_v4 = vpop.permute.xlu2 %476 }
 0x286   :  { %v480_v5 = vsel %vm469_vm8, %v477_v4, %v479_v3  ;;  %v483_v22 = vmul.f32 %v477_v4, %v1203_v38 }
 0x287   :  { %v484_v6 = vmul.f32 %v480_v5, %v131_v0 }
 0x289   :  { %489 = vrot.lane.b32.xlu2 %v484_v6, %s1047_s17 }
 0x28d   :  { %v540_v37 = vpop.permute.xlu2 %539 }
 0x295   :  { %v601_v25 = vpop.permute.xlu2 %600 }
 0x296   :  { %v607_v29 = vmul.f32 %v601_v25, %v1203_v38 }
 0x298   :  { %v611_v40 = vrot.slane %v607_v29, 4 }
 0x29f   :  { %v664_v14 = vpop.permute.xlu1 %663  ;;  %v538_v15 = vpop.permute.xlu0 %537 }
 0x2a0   :  { %v541_v16 = vsel %vm469_vm8, %v538_v15, %v540_v37  ;;  %v544_v17 = vmul.f32 %v538_v15, %v1203_v38  ;;  %v670_v27 = vmul.f32 %v664_v14, %v1203_v38 }
 0x2a1   :  { %v545_v21 = vmul.f32 %v541_v16, %v131_v0 }
 0x2a2   :  { %v548_v23 = vrot.slane %v544_v17, 2  ;;  %v674_v32 = vrot.slane %v670_v27, 6 }
 0x2a3   :  { %v549_v26 = vrot.slane %v545_v21, 2  ;;  %v753_v21 = vlaneseq }
 0x2a4   :  { %v945_v28 = vpack.i.bf16 %v548_v23, %v483_v22  ;;  %v950_v43 = vpack.i.bf16 %v611_v40, %v674_v32 }
 0x2a5   :  { %552 = vrot.lane.b32.xlu1 %v549_v26, %s1047_s17  ;;  %v754_v22 = vshrl.u32 %v753_v21, 7  ;;  %v796_v21 = vperm.slane %v1215_v51, 0 }
 0x2a6   :  { %946 = vrot.lane.b32.xlu0 %v945_v28, %s1047_s17 }
 0x2a7   :  { %v603_v30 = vpop.permute.xlu1 %602  ;;  %v666_v31 = vpop.permute.xlu0 %665  ;;  %956 = vset.pattern.permute.xlu1 %v754_v22  ;;  %955 = vset.pattern.permute.xlu2 %v754_v22 }
 0x2a8   :  { %v604_v33 = vsel %vm469_vm8, %v601_v25, %v603_v30  ;;  %v667_v35 = vsel %vm469_vm8, %v664_v14, %v666_v31 }
 0x2a9   :  { %v608_v36 = vmul.f32 %v604_v33, %v131_v0  ;;  %v671_v39 = vmul.f32 %v667_v35, %v131_v0 }
 0x2ab   :  { %v612_v41 = vrot.slane %v608_v36, 4  ;;  %v675_v42 = vrot.slane %v671_v39, 6 }
 0x2ad   :  { %615 = vrot.lane.b32.xlu1 %v612_v41, %s1047_s17  ;;  %678 = vrot.lane.b32.xlu2 %v675_v42, %s1047_s17 }
 0x2ae   :  { %951 = vrot.lane.b32.xlu0 %v950_v43, %s1047_s17  ;;  %s1050_s17 = smov 1  }
 0x2b6   :  { %726 = vperm.xlu0 %943, %v724_v44  }
 0x2be   :  { %957 = vset.pattern.permute.xlu0 %v754_v22  ;;  %v855_v22 = vld [vmem:[#allocation1 + $0x7] ss:$9 sm:$0xff] }
 0x2e3   :  { %v490_v63 = vpop.permute.xlu2 %489 }
 0x2e4   :  { %929 = vmatmul.msk.f32.vlgmr.msrb.gmra.mxu3 %vm469_vm8, %v490_v63 }
 0x307   :  { %v679_v10 = vpop.permute.xlu2 %678 }
 0x317   :  { %v553_v0 = vpop.permute.xlu1 %552 }
 0x318   :  { %930 = vmatmul.msk.f32.vlgmr.msrb.gmra.mxu1 %vm469_vm8, %v553_v0  ;;  %v947_v3 = vpop.permute.xlu0 %946 }
 0x319   :  { %v949_v4 = vunpack.i.h.bf16 %v947_v3  ;;  %v948_v5 = vunpack.i.l.bf16 %v947_v3 }
 0x31b   :  { %v491_v6 = vsel %vm469_vm8, %v948_v5, %v490_v63  ;;  %v554_v7 = vsel %vm469_vm8, %v949_v4, %v553_v0  ;;  %v365_v5 = vrot.slane %v1251_v60, 4  ;;  %v797_v60 = vperm.slane %v1217_v52, 0 }
 0x31c   :  { %511 = vmatmul.f32.vlgmr.msra.gmra.mxu2 %v491_v6  ;;  %574 = vmatmul.f32.vlgmr.msra.gmra.mxu0 %v554_v7 }
 0x31f   :  { %v616_v8 = vpop.permute.xlu1 %615 }
 0x320   :  { %931 = vmatmul.msk.f32.vlgmr.msra.gmra.mxu1 %vm469_vm8, %v616_v8  ;;  %v952_v34 = vpop.permute.xlu0 %951 }
 0x321   :  { %v954_v37 = vunpack.i.h.bf16 %v952_v34  ;;  %v953_v9 = vunpack.i.l.bf16 %v952_v34  ;;  %v355_v34 = vrot.slane %v1248_v56, 2  ;;  %v827_v56 = vperm.slane %v1229_v2, 0 }
 0x322   :  { %v826_v2 = vperm.slane %v1227_v1, 0 }
 0x323   :  { %v617_v11 = vsel %vm469_vm8, %v954_v37, %v616_v8  ;;  %v680_v14 = vsel %vm469_vm8, %v953_v9, %v679_v10  ;;  %v360_v8 = vrot.slane %v1257_v18, 6 }
 0x324   :  { %637 = vmatmul.f32.vlgmr.msra.gmra.mxu3 %v617_v11  ;;  %700 = vmatmul.f32.vlgmr.msrb.gmra.mxu2 %v680_v14 }
 0x325   :  { %932 = vmatmul.msk.f32.vlgmr.msrb.gmra.mxu0 %vm469_vm8, %v679_v10  ;;  %v767_v10 = vrot.slane %v1203_v38, 1 }
 0x327   :  { %v769_v14 = vperm.slane %v767_v10, 0 }
 0x328   :  { %v727_v23 = vpop.permute.xlu0 %726 }
 0x329   :  { %vm728_vm10 = vcmp.eq.s32.totalorder %v727_v23, 1  ;;  %v768_v23 = vperm.slane %v1203_v38, 0 }
 0x367   :  { %v532_v17 = vpop.f32.mrf.mxu3 }
 0x395   :  { %v595_v15 = vpop.f32.mrf.mxu1 }
 0x399   :  { %v575_v16 = vpop.f32.mrf.mxu0 }
 0x39a   :  { %v596_v31 = vadd.f32 %v595_v15, %v575_v16 }
 0x39d   :  { %v658_v24 = vpop.f32.mrf.mxu1 }
 0x39f   :  { %v512_v19 = vpop.f32.mrf.mxu2 }
 0x3a0   :  { %v533_v26 = vadd.f32 %v532_v17, %v512_v19 }
 0x3a2   :  { %v721_v25 = vpop.f32.mrf.mxu0  ;;  %v730_v33 = vmax.f32 %v533_v26, %v596_v31 }
 0x3a7   :  { %v638_v27 = vpop.f32.mrf.mxu3  ;;  %v701_v28 = vpop.f32.mrf.mxu2 }
 0x3a8   :  { %v659_v29 = vadd.f32 %v658_v24, %v638_v27  ;;  %v722_v30 = vadd.f32 %v721_v25, %v701_v28  ;;  %v857_v27 = vperm.slane %v855_v22, 0 }
 0x3aa   :  { %v729_v32 = vsel %vm728_vm10, -inf, %v722_v30 }
 0x3ab   :  { %v731_v35 = vmax.f32 %v659_v29, %v729_v32 }
 0x3ad   :  { %v732_v36 = vmax.f32 %v730_v33, %v731_v35  ;;  %v853_v35 = vld [vmem:[#allocation1 + $0x6] ss:$9 sm:$0xff] }
 0x3af   :  { %v733_v39 = vsub.f32 %v533_v26, %v732_v36  ;;  %v736_v40 = vsub.f32 %v596_v31, %v732_v36  ;;  %v739_v41 = vsub.f32 %v659_v29, %v732_v36  ;;  %v742_v42 = vsub.f32 %v729_v32, %v732_v36 }
 0x3b0   :  { %v856_v36 = vperm.slane %v853_v35, 0 }
 0x3b1   :  { %v734_v43 = vmul.f32 1.442695, %v733_v39  ;;  %v737_v44 = vmul.f32 1.442695, %v736_v40  ;;  %v740_v45 = vmul.f32 1.442695, %v739_v41 }
 0x3b2   :  { %v743_v20 = vmul.f32 1.442695, %v742_v42 }
 0x3b3   :  { %982 = vpow2.f32 %v734_v43 }
 0x3b4   :  { %984 = vpow2.f32 %v737_v44 }
 0x3b5   :  { %986 = vpow2.f32 %v740_v45 }
 0x3b6   :  { %988 = vpow2.f32 %v743_v20 }
 0x3b9   :  { %v983_v12 = vpop.eup %982 }
 0x3ba   :  { %v985_v46 = vpop.eup %984 }
 0x3bb   :  { %v745_v47 = vadd.f32 %v985_v46, %v983_v12  ;;  %v987_v48 = vpop.eup %986 }
 0x3bc   :  { %v989_v50 = vpop.eup %988 }
 0x3bd   :  { %v746_v49 = vadd.f32 %v987_v48, %v745_v47 }
 0x3bf   :  { %v747_v53 = vadd.f32 %v989_v50, %v746_v49 }
 0x3c1   :  { %990 = vrcp.f32 %v747_v53 }
 0x3c7   :  { %v991_v54 = vpop.eup %990 }
 0x3c8   :  { %v774_v55 = vmul.f32 %v991_v54, %v985_v46  ;;  %v749_v57 = vmul.f32 %v991_v54, %v983_v12  ;;  %v834_v58 = vmul.f32 %v991_v54, %v989_v50  ;;  %v804_v59 = vmul.f32 %v991_v54, %v987_v48 }
 0x3ca   :  { %v777_v61 = vperm.slane %v774_v55, 0  ;;  %776 = vst.msk [vmem:[#allocation2 + $0x2] sm:$0x3] %vm750_vm11, %v774_v55  ;;  %v759_v62 = vperm.slane %v749_v57, 1  ;;  %v752_v63 = vperm.slane %v749_v57, 0  ;;  %v844_v0 = vperm.slane %v834_v58, 1 }
 0x3cb   :  { %751 = vst.msk [vmem:[#allocation2] sm:$0x3] %vm750_vm11, %v749_v57  ;;  %v807_v3 = vperm.slane %v804_v59, 0  ;;  %v784_v4 = vperm.slane %v774_v55, 1  ;;  %v837_v6 = vperm.slane %v834_v58, 0  ;;  %v814_v7 = vperm.slane %v804_v59, 1 }
 0x3cc   :  { %782 = vperm.xlu0 %957, %v777_v61   ;;  %764 = vperm.xlu1 %956, %v759_v62   ;;  %836 = vst.msk [vmem:[#allocation2 + $0x6] sm:$0x3] %vm750_vm11, %v834_v58 }
 0x3cd   :  { %757 = vperm.xlu2 %955, %v752_v63   ;;  %806 = vst.msk [vmem:[#allocation2 + $0x4] sm:$0x3] %vm750_vm11, %v804_v59 }
 0x3ce   :  { %889 = dma.vmem_to_hbm [thread:$0]  %s882_s22, 128, %s884_s20, [#allocation3], %s1046_s16, %s1046_s16, %s1049_s15  }
 0x3cf   :  { %s895_s16 = sshll.u32 %s1052_s8, 4  ;;  %s896_s16 = int_to_ptr.vmem [resolvable:$true] %s895_s16 }
 0x3d4   :  { %849 = vperm.xlu0 %957, %v844_v0   ;;  %812 = vperm.xlu1 %956, %v807_v3  }
 0x3d5   :  { %789 = vperm.xlu2 %955, %v784_v4  }
 0x3dc   :  { %366 = vrot.lane.b32.xlu0 %v365_v5, %s1048_s6  ;;  %842 = vperm.xlu1 %956, %v837_v6  }
 0x3dd   :  { %819 = vperm.xlu2 %955, %v814_v7  }
 0x3e4   :  { %361 = vrot.lane.b32.xlu1 %v360_v8, %s1049_s15 }
 0x3e5   :  { %356 = vrot.lane.b32.xlu2 %v355_v34, %s1050_s17 }
 0x427   :  { %v758_v37 = vpop.permute.xlu2 %757 }
 0x428   :  { %v772_v26 = vmul.f32 %v768_v23, %v758_v37 }
 0x42f   :  { %v790_v9 = vpop.permute.xlu2 %789 }
 0x430   :  { %v801_v18 = vmul.f32 %v797_v60, %v790_v9 }
 0x437   :  { %v820_v11 = vpop.permute.xlu2 %819 }
 0x438   :  { %v831_v19 = vmul.f32 %v827_v56, %v820_v11 }
 0x43e   :  { %v783_v15 = vpop.permute.xlu0 %782  ;;  %v765_v16 = vpop.permute.xlu1 %764 }
 0x43f   :  { %v773_v17 = vmul.f32 %v769_v14, %v765_v16  ;;  %v800_v24 = vmul.f32 %v796_v21, %v783_v15  ;;  %v357_v41 = vpop.permute.xlu2 %356 }
 0x440   :  { %v370_v1 = vsel %vm369_vm12, %v1254_v13, %v357_v41 }
 0x441   :  { %v803_v52 = vadd.f32 %v801_v18, %v773_v17  ;;  %v802_v30 = vadd.f32 %v800_v24, %v772_v26 }
 0x443   :  { %v833_v25 = vadd.f32 %v831_v19, %v803_v52 }
 0x446   :  { %v850_v28 = vpop.permute.xlu0 %849  ;;  %v813_v29 = vpop.permute.xlu1 %812 }
 0x447   :  { %v861_v31 = vmul.f32 %v857_v27, %v850_v28  ;;  %v830_v32 = vmul.f32 %v826_v2, %v813_v29 }
 0x449   :  { %v863_v33 = vadd.f32 %v861_v31, %v833_v25  ;;  %v832_v51 = vadd.f32 %v830_v32, %v802_v30 }
 0x44b   :  { %868 = vrot.lane.b32.xlu1 %v863_v33, %s1045_s1 }
 0x44e   :  { %v843_v39 = vpop.permute.xlu1 %842  ;;  %v367_v43 = vpop.permute.xlu0 %366 }
 0x44f   :  { %v860_v40 = vmul.f32 %v856_v36, %v843_v39 }
 0x451   :  { %v862_v38 = vadd.f32 %v860_v40, %v832_v51 }
 0x453   :  { %866 = vrot.lane.b32.xlu2 %v862_v38, %s1045_s1 }
 0x456   :  { %v362_v42 = vpop.permute.xlu1 %361 }
 0x457   :  { %v372_v44 = vsel %vm371_vm13, %v370_v1, %v362_v42 }
 0x458   :  { %v374_v45 = vsel %vm373_vm14, %v372_v44, %v367_v43 }
 0x459   :  { %376 = vst.msk [vmem:[#allocation4] sm:$0x3] %vm375_vm15, %v374_v45 }
 0x45a   :  { %900 = dma.vmem_to_hbm [thread:$0]  %s896_s16, 32, %s898_s3, [#allocation5]  }
 0x4ad   :  { %v867_v20 = vpop.permute.xlu2 %866 }
 0x4ae   :  { %873 = vst.msk [vmem:[%s1487_s7] sm:$0x3f] %vm872_vm0, %v867_v20 }
 0x4bd   :  { %v869_v12 = vpop.permute.xlu1 %868 }
 0x4be   :  { %874 = vst.msk [vmem:[%s1487_s7 + $0x8] sm:$0x3f] %vm872_vm0, %v869_v12 }
 0x4bf   :  { %1040 = dma.done.wait [#allocation3], 128  }
 0x4c0   :  { %1041 = vsyncadd [#allocation3], 4294967168 }
 0x4c1   :  { %1042 = dma.done.wait [#allocation5], 32  }
 0x4c2   :  { %1043 = vsyncadd [#allocation5], 4294967264 }
 0x4c3   :  { %911 = vsyncpa [#allocation3], 1 }
 0x4c4   :  { %912 = vsyncpa [#allocation5], 1 }

// kernel: tpu_custom_call.1
= control target key start
LH: loop header
LB: loop body
LE: loop exit
PB: predicated region body
PF: predicated region fallthrough
CT: control target
= control target key end

     0   :  { %15 = vsyncpa [#allocation3], 0  ;;  %vm69_vm0 = vcmask 1041408   ;;  %vm71_vm1 = vcmask 1043456   ;;  %vm73_vm2 = vcmask 1045504   ;;  %vm89_vm3 = vcmask 261120   ;;  %s1480_s0 = inlined_call_operand.vmem [shape: f32[4,2,32], index: 0, kind: input, shape index: {}]   ;;  %s1481_s1 = inlined_call_operand.vmem [shape: f32[2,1], index: 1, kind: input, shape index: {}]   ;;  %s1482_s2 = inlined_call_operand.vmem [shape: f32[32,768], index: 2, kind: input, shape index: {}]   ;;  %s1483_s3 = inlined_call_operand.vmem [shape: f32[1,768], index: 3, kind: input, shape index: {}]   ;;  %s1484_s4 = inlined_call_operand.vmem [shape: f32[4,1,128], index: 4, kind: input, shape index: {}]   ;;  %s1485_s5 = inlined_call_operand.vmem [shape: f32[4,1,1], index: 5, kind: input, shape index: {}]   ;;  %s1486_s6 = inlined_call_operand.vmem [shape: f32[192,6], index: 6, kind: input, shape index: {}]   ;;  %s1487_s7 = inlined_call_operand.vmem [shape: f32[2,6,32], index: 7, kind: output, shape index: {0}]   ;;  %s1488_s8 = inlined_call_operand.hbm [shape: f32[4,2,6], index: 8, kind: output, shape index: {1}]   ;;  %s1489_s9 = inlined_call_operand.hbm [shape: f32[2,4], index: 9, kind: output, shape index: {2}]  }
   0x1   :  { %v50_v0 = vld [vmem:[%s1482_s2 + $0x90] sm:$0xff]  ;;  %v51_v1 = vld [vmem:[%s1482_s2 + $0x98] sm:$0xff]  ;;  %v53_v2 = vld [vmem:[%s1482_s2 + $0xa8] sm:$0xff] }
   0x2   :  { %105 = vmatpush.msra.mxu0 %v50_v0  ;;  %125 = vmatpush.msra.mxu1 %v51_v1  ;;  %v44_v3 = vld [vmem:[%s1482_s2 + $0x60] sm:$0xff]  ;;  %v45_v4 = vld [vmem:[%s1482_s2 + $0x68] sm:$0xff]  ;;  %v47_v5 = vld [vmem:[%s1482_s2 + $0x78] sm:$0xff] }
   0x3   :  { %165 = vmatpush.msra.mxu3 %v53_v2  ;;  %v38_v6 = vld [vmem:[%s1482_s2 + $0x30] sm:$0xff]  ;;  %v39_v7 = vld [vmem:[%s1482_s2 + $0x38] sm:$0xff]  ;;  %v41_v8 = vld [vmem:[%s1482_s2 + $0x48] sm:$0xff] }
   0x4   :  { %106 = vmatpush.msra.mxu0 %v44_v3  ;;  %126 = vmatpush.msra.mxu1 %v45_v4  ;;  %v32_v9 = vld [vmem:[%s1482_s2] sm:$0xff]  ;;  %v33_v10 = vld [vmem:[%s1482_s2 + $0x8] sm:$0xff]  ;;  %v35_v14 = vld [vmem:[%s1482_s2 + $0x18] sm:$0xff] }
   0x5   :  { %166 = vmatpush.msra.mxu3 %v47_v5  ;;  %v56_v11 = vld [vmem:[%s1480_s0] sm:$0x3]  ;;  %v57_v12 = vld [vmem:[%s1480_s0 + $0x2] sm:$0x3]  ;;  %v58_v13 = vld [vmem:[%s1480_s0 + $0x4] sm:$0x3] }
   0x6   :  { %107 = vmatpush.msra.mxu0 %v38_v6  ;;  %127 = vmatpush.msra.mxu1 %v39_v7  ;;  %v59_v15 = vld [vmem:[%s1480_s0 + $0x6] sm:$0x3]  ;;  %v61_v16 = vrot.slane %v57_v12, 6  ;;  %v64_v17 = vrot.slane %v58_v13, 4  ;;  %v54_v20 = vld [vmem:[%s1482_s2 + $0xb0] sm:$0xff] }
   0x7   :  { %v52_v18 = vld [vmem:[%s1482_s2 + $0xa0] sm:$0xff]  ;;  %167 = vmatpush.msra.mxu3 %v41_v8  ;;  %v67_v19 = vrot.slane %v59_v15, 2  ;;  %v46_v23 = vld [vmem:[%s1482_s2 + $0x70] sm:$0xff] }
   0x8   :  { %108 = vmatpush.msra.mxu0 %v32_v9  ;;  %128 = vmatpush.msra.mxu1 %v33_v10  ;;  %v70_v21 = vsel %vm69_vm0, %v56_v11, %v61_v16  ;;  %v48_v24 = vld [vmem:[%s1482_s2 + $0x80] sm:$0xff]  ;;  %v42_v27 = vld [vmem:[%s1482_s2 + $0x50] sm:$0xff] }
   0x9   :  { %168 = vmatpush.msra.mxu3 %v35_v14  ;;  %v72_v22 = vsel %vm71_vm1, %v70_v21, %v64_v17  ;;  %v40_v26 = vld [vmem:[%s1482_s2 + $0x40] sm:$0xff]  ;;  %v34_v28 = vld [vmem:[%s1482_s2 + $0x10] sm:$0xff] }
   0xa   :  { %145 = vmatpush.msrb.mxu1 %v52_v18  ;;  %v74_v25 = vsel %vm73_vm2, %v72_v22, %v67_v19  ;;  %185 = vmatpush.msrb.mxu0 %v54_v20 }
   0xb   :  { %913 = vmatmul.msk.f32.vlgmr.msra.gmra.mxu0 %vm89_vm3, %v74_v25  ;;  %914 = vmatmul.msk.f32.vlgmr.msra.gmra.mxu1 %vm89_vm3, %v74_v25 }
   0xc   :  { %916 = vmatmul.msk.f32.vlgmr.msra.gmra.mxu3 %vm89_vm3, %v74_v25  ;;  %146 = vmatpush.msrb.mxu1 %v46_v23 }
   0xd   :  { %186 = vmatpush.msrb.mxu0 %v48_v24 }
   0xe   :  { %16 = vsyncpa [#allocation5], 0  ;;  %147 = vmatpush.msrb.mxu1 %v40_v26  ;;  %v36_v29 = vld [vmem:[%s1482_s2 + $0x20] sm:$0xff]  ;;  %v55_v30 = vld [vmem:[%s1482_s2 + $0xb8] sm:$0xff]  ;;  %vm253_vm4 = vcmask 1043458   ;;  %vm289_vm5 = vcmask 1045508  }
   0xf   :  { %187 = vmatpush.msrb.mxu0 %v42_v27  ;;  %v49_v31 = vld [vmem:[%s1482_s2 + $0x88] sm:$0xff]  ;;  %v43_v32 = vld [vmem:[%s1482_s2 + $0x58] sm:$0xff]  ;;  %v1198_v34 = vld [vmem:[%s1483_s3] sm:$0x3f]  ;;  %vm325_vm6 = vcmask 1047558   ;;  %v1044_v12 = vmov 0  }
  0x10   :  { %148 = vmatpush.msrb.mxu1 %v34_v28  ;;  %v37_v33 = vld [vmem:[%s1482_s2 + $0x28] sm:$0xff]  ;;  %v77_v35 = vperm.slane %v1198_v34, 0  ;;  %v80_v39 = vperm.slane %v1198_v34, 3  ;;  %v81_v40 = vperm.slane %v1198_v34, 4  ;;  %v79_v41 = vperm.slane %v1198_v34, 2  ;;  %942 = vset.pattern.permute.xlu2 %v1044_v12  ;;  %s1046_s16 = smov 32  }
  0x11   :  { %188 = vmatpush.msrb.mxu0 %v36_v29  ;;  %v958_v46 = vld [vmem:[%s1484_s4 + $0x1] ss:$0 sm:$0xff]  ;;  %v959_v48 = vld [vmem:[%s1484_s4 + $0x2] ss:$0 sm:$0xff]  ;;  %v82_v55 = vperm.slane %v1198_v34, 5  ;;  %943 = vset.pattern.permute.xlu0 %v1044_v12  ;;  %s1047_s17 = smov 64  }
  0x12   :  { %205 = vmatpush.msra.mxu1 %v55_v30  ;;  %v960_v59 = vld [vmem:[%s1484_s4] ss:$0 sm:$0xff]  ;;  %v961_v63 = vld [vmem:[%s1484_s4 + $0x3] ss:$0 sm:$0xff]  ;;  %v962_v7 = vld [vmem:[%s1485_s5 + $0x1] ss:$0 sm:$0xff]  ;;  %944 = vset.pattern.permute.xlu1 %v1044_v12 }
  0x13   :  { %915 = vmatmul.msk.f32.vlgmr.msrb.gmra.mxu1 %vm89_vm3, %v74_v25  ;;  %917 = vmatmul.msk.f32.vlgmr.msrb.gmra.mxu0 %vm89_vm3, %v74_v25  ;;  %v963_v8 = vld [vmem:[%s1485_s5 + $0x2] ss:$0 sm:$0xff]  ;;  %v964_v16 = vld [vmem:[%s1485_s5] ss:$0 sm:$0xff]  ;;  %v965_v17 = vld [vmem:[%s1485_s5 + $0x3] ss:$0 sm:$0xff] }
  0x14   :  { %206 = vmatpush.msra.mxu1 %v49_v31  ;;  %s1049_s15 = smov 2   ;;  %s883_s20 = sshll.u32 %s1488_s8, 4  ;;  %s884_s20 = int_to_ptr.hbm [resolvable:$true] %s883_s20 }
  0x15   :  { %s1051_s21 = smov [#allocation2]   ;;  %s1052_s8 = smov [#allocation4]  }
  0x16   :  { %207 = vmatpush.msra.mxu1 %v43_v32  ;;  %s881_s22 = sshll.u32 %s1051_s21, 4  ;;  %s897_s3 = sshll.u32 %s1489_s9, 4  ;;  %s882_s22 = int_to_ptr.vmem [resolvable:$true] %s881_s22  ;;  %s898_s3 = int_to_ptr.hbm [resolvable:$true] %s897_s3 }
  0x18   :  { %208 = vmatpush.msra.mxu1 %v37_v33 }
  0x1b   :  { %918 = vmatmul.msk.f32.vlgmr.msra.gmra.mxu1 %vm89_vm3, %v74_v25 }
  0x88   :  { %v110_v36 = vpop.f32.mrf.mxu0  ;;  %v1201_v37 = vpop.f32.mrf.mxu1 }
  0x89   :  { %v1203_v38 = vadd.f32 %v110_v36, %v77_v35 }
  0x8b   :  { %791 = vst [vmem:[#allocation1] sm:$0xff] %v1203_v38 }
  0x8f   :  { %v170_v42 = vpop.f32.mrf.mxu3 }
  0x90   :  { %v171_v43 = vadd.f32 %v170_v42, %v80_v39  ;;  %v150_v44 = vpop.f32.mrf.mxu1  ;;  %v190_v45 = vpop.f32.mrf.mxu0 }
  0x91   :  { %v191_v47 = vadd.f32 %v190_v45, %v81_v40  ;;  %v151_v50 = vadd.f32 %v150_v44, %v79_v41 }
  0x92   :  { %v246_v49 = vmax.f32 %v171_v43, 0.0  ;;  %v1215_v51 = vld [vmem:[#allocation1 + $0x2] ss:$9 sm:$0xff] }
  0x93   :  { %v1217_v52 = vld [vmem:[#allocation1 + $0x3] ss:$9 sm:$0xff]  ;;  %v282_v53 = vmax.f32 %v191_v47, 0.0  ;;  %v213_v57 = vmax.f32 %v151_v50, 0.0 }
  0x94   :  { %821 = vst [vmem:[#allocation1] sm:$0xff] %v1203_v38  ;;  %v252_v54 = vmul.f32 %v958_v46, %v246_v49 }
  0x95   :  { %v288_v56 = vmul.f32 %v959_v48, %v282_v53  ;;  %v218_v0 = vmul.f32 %v960_v59, %v213_v57 }
  0x96   :  { %v254_v58 = vsel %vm253_vm4, %v252_v54, 0.0 }
  0x97   :  { %255 = vadd.xlane.f32.xlu0 %v254_v58  ;;  %v290_v60 = vsel %vm289_vm5, %v288_v56, 0.0  ;;  %v219_v5 = vsel %vm69_vm0, %v218_v0, 0.0 }
  0x98   :  { %v210_v61 = vpop.f32.mrf.mxu1  ;;  %291 = vadd.xlane.f32.xlu1 %v290_v60 }
  0x99   :  { %v211_v62 = vadd.f32 %v210_v61, %v82_v55 }
  0x9b   :  { %v1227_v1 = vld [vmem:[#allocation1 + $0x4] ss:$9 sm:$0xff]  ;;  %v318_v3 = vmax.f32 %v211_v62, 0.0 }
  0x9c   :  { %v1229_v2 = vld [vmem:[#allocation1 + $0x5] ss:$9 sm:$0xff] }
  0x9d   :  { %851 = vst [vmem:[#allocation1] sm:$0xff] %v1203_v38  ;;  %v324_v4 = vmul.f32 %v961_v63, %v318_v3 }
  0x9f   :  { %220 = vadd.xlane.f32.xlu0 %v219_v5  ;;  %v326_v6 = vsel %vm325_vm6, %v324_v4, 0.0 }
  0xa0   :  { %327 = vadd.xlane.f32.xlu1 %v326_v6 }
 0x10a   :  { %v256_v9 = vpop.xlane.xlu0 %255 }
 0x10b   :  { %v262_v10 = vadd.f32 %v962_v7, %v256_v9  ;;  %v292_v11 = vpop.xlane.xlu1 %291 }
 0x10c   :  { %v298_v13 = vadd.f32 %v963_v8, %v292_v11 }
 0x10d   :  { %v922_v14 = vmul.f32 -1.442695, %v262_v10 }
 0x10e   :  { %v925_v15 = vmul.f32 -1.442695, %v298_v13 }
 0x10f   :  { %966 = vpow2.f32 %v922_v14 }
 0x110   :  { %968 = vpow2.f32 %v925_v15 }
 0x112   :  { %v221_v18 = vpop.xlane.xlu0 %220 }
 0x113   :  { %v226_v19 = vadd.f32 %v964_v16, %v221_v18  ;;  %v328_v20 = vpop.xlane.xlu1 %327 }
 0x114   :  { %v334_v21 = vadd.f32 %v965_v17, %v328_v20  ;;  %v1263_v20 = vld [vmem:[%s1481_s1] sm:$0x3]  ;;  %s1045_s1 = smov 96  }
 0x115   :  { %v967_v22 = vpop.eup %966  ;;  %v919_v23 = vmul.f32 -1.442695, %v226_v19 }
 0x116   :  { %v969_v24 = vpop.eup %968  ;;  %v266_v25 = vadd.f32 1.0, %v967_v22  ;;  %v928_v26 = vmul.f32 -1.442695, %v334_v21  ;;  %v424_v21 = vsub.f32 1.0, %v1263_v20 }
 0x117   :  { %v302_v27 = vadd.f32 1.0, %v969_v24  ;;  %970 = vpow2.f32 %v919_v23 }
 0x118   :  { %972 = vrcp.f32 %v266_v25  ;;  %vm272_vm7 = vweird.f32 %v266_v25  ;;  %v278_v36 = vand.u32 2147483648, %v266_v25  ;;  %v276_v41 = vand.u32 2147483647, %v266_v25 }
 0x119   :  { %974 = vrcp.f32 %v302_v27  ;;  %v314_v44 = vand.u32 2147483648, %v302_v27  ;;  %v312_v47 = vand.u32 2147483647, %v302_v27  ;;  %vm308_vm12 = vweird.f32 %v302_v27 }
 0x11a   :  { %976 = vpow2.f32 %v928_v26  ;;  %v279_v45 = vor.u32 1.1754944e-38, %v278_v36  ;;  %vm277_vm11 = vcmp.eq.f32.partialorder %v276_v41, 8.507059e+37 }
 0x11b   :  { %v315_v55 = vor.u32 1.1754944e-38, %v314_v44  ;;  %vm313_vm14 = vcmp.eq.f32.partialorder %v312_v47, 8.507059e+37 }
 0x11d   :  { %v971_v28 = vpop.eup %970 }
 0x11e   :  { %v973_v29 = vpop.eup %972  ;;  %v230_v30 = vadd.f32 1.0, %v971_v28 }
 0x11f   :  { %v975_v31 = vpop.eup %974  ;;  %v268_v32 = vmul.f32 %v973_v29, %v266_v25  ;;  %vm273_vm8 = vweird.f32 %v973_v29 }
 0x120   :  { %v977_v33 = vpop.eup %976  ;;  %v304_v35 = vmul.f32 %v975_v31, %v302_v27  ;;  %978 = vrcp.f32 %v230_v30  ;;  %vm274_vm9 = vmor %vm272_vm7, %vm273_vm8  ;;  %vm309_vm10 = vweird.f32 %v975_v31  ;;  %v242_v0 = vand.u32 2147483648, %v230_v30 }
 0x121   :  { %v338_v39 = vadd.f32 1.0, %v977_v33  ;;  %v269_v40 = vsub.f32 1.0, %v268_v32  ;;  %vm310_vm13 = vmor %vm308_vm12, %vm309_vm10  ;;  %v240_v4 = vand.u32 2147483647, %v230_v30  ;;  %vm236_vm0 = vweird.f32 %v230_v30 }
 0x122   :  { %v305_v42 = vsub.f32 1.0, %v304_v35  ;;  %v243_v8 = vor.u32 1.1754944e-38, %v242_v0  ;;  %vm469_vm8 = vcmask 523264   ;;  %vm369_vm12 = vcmask 7168  }
 0x123   :  { %980 = vrcp.f32 %v338_v39  ;;  %v270_v43 = vmul.f32 %v973_v29, %v269_v40  ;;  %v350_v7 = vand.u32 2147483648, %v338_v39  ;;  %v348_v10 = vand.u32 2147483647, %v338_v39 }
 0x124   :  { %v306_v46 = vmul.f32 %v975_v31, %v305_v42  ;;  %vm241_vm4 = vcmp.eq.f32.partialorder %v240_v4, 8.507059e+37  ;;  %vm344_vm5 = vweird.f32 %v338_v39 }
 0x125   :  { %v271_v48 = vadd.f32 %v973_v29, %v270_v43  ;;  %v351_v16 = vor.u32 1.1754944e-38, %v350_v7  ;;  %vm349_vm7 = vcmp.eq.f32.partialorder %v348_v10, 8.507059e+37  ;;  %v1291_v7 = vld [vmem:[%s1486_s6 + $0xb8] sm:$0xff] }
 0x126   :  { %v979_v49 = vpop.eup %978  ;;  %v307_v50 = vadd.f32 %v975_v31, %v306_v46  ;;  %523 = vmatpush.msrb.mxu3 %v1291_v7  ;;  %586 = vmatpush.msrb.mxu1 %v1291_v7  ;;  %v1317_v10 = vld [vmem:[%s1486_s6 + $0x98] sm:$0xff] }
 0x127   :  { %v232_v53 = vmul.f32 %v979_v49, %v230_v30  ;;  %v275_v54 = vsel %vm274_vm9, %v973_v29, %v271_v48  ;;  %vm237_vm15 = vweird.f32 %v979_v49  ;;  %vm471_vm9 = vcmask 785408  }
 0x128   :  { %v1248_v56 = vsel %vm277_vm11, %v279_v45, %v275_v54  ;;  %v311_v57 = vsel %vm310_vm13, %v975_v31, %v307_v50  ;;  %vm238_vm1 = vmor %vm236_vm0, %vm237_vm15  ;;  %vm750_vm11 = vcmask 41984   ;;  %vm371_vm13 = vcmask 15360  }
 0x129   :  { %v981_v58 = vpop.eup %980  ;;  %v384_v59 = vsub.f32 1.0, %v1248_v56  ;;  %v1251_v60 = vsel %vm313_vm14, %v315_v55, %v311_v57  ;;  %v233_v61 = vsub.f32 1.0, %v232_v53  ;;  %vm373_vm14 = vcmask 23552  }
 0x12a   :  { %v340_v62 = vmul.f32 %v981_v58, %v338_v39  ;;  %v391_v63 = vsub.f32 1.0, %v1251_v60  ;;  %vm345_vm2 = vweird.f32 %v981_v58  ;;  %vm375_vm15 = vcmask 25600  }
 0x12b   :  { %387 = vperm.xlu2 %942, %v384_v59   ;;  %v234_v3 = vmul.f32 %v979_v49, %v233_v61  ;;  %vm346_vm6 = vmor %vm344_vm5, %vm345_vm2  ;;  %vm872_vm0 = vcmask 259072  }
 0x12c   :  { %394 = vperm.xlu0 %943, %v391_v63   ;;  %v341_v5 = vsub.f32 1.0, %v340_v62  ;;  %v78_v63 = vperm.slane %v1198_v34, 1  ;;  %v1303_v34 = vld [vmem:[%s1486_s6 + $0xa8] sm:$0xff] }
 0x12d   :  { %v235_v6 = vadd.f32 %v979_v49, %v234_v3 }
 0x12e   :  { %v342_v9 = vmul.f32 %v981_v58, %v341_v5  ;;  %v131_v0 = vadd.f32 %v1201_v37, %v78_v63 }
 0x12f   :  { %v239_v11 = vsel %vm238_vm1, %v979_v49, %v235_v6 }
 0x130   :  { %v1254_v13 = vsel %vm241_vm4, %v243_v8, %v239_v11  ;;  %v343_v14 = vadd.f32 %v981_v58, %v342_v9  ;;  %v1296_v8 = vld [vmem:[%s1486_s6 + $0xb0] sm:$0xff]  ;;  %v1310_v9 = vld [vmem:[%s1486_s6 + $0xa0] sm:$0xff] }
 0x131   :  { %v377_v15 = vsub.f32 1.0, %v1254_v13  ;;  %524 = vmatpush.msrb.mxu3 %v1296_v8  ;;  %587 = vmatpush.msrb.mxu1 %v1296_v8  ;;  %v1324_v11 = vld [vmem:[%s1486_s6 + $0x90] sm:$0xff] }
 0x132   :  { %v347_v17 = vsel %vm346_vm6, %v981_v58, %v343_v14 }
 0x133   :  { %380 = vperm.xlu2 %942, %v377_v15   ;;  %v1257_v18 = vsel %vm349_vm7, %v351_v16, %v347_v17  ;;  %525 = vmatpush.msrb.mxu3 %v1303_v34 }
 0x134   :  { %v398_v19 = vsub.f32 1.0, %v1257_v18  ;;  %588 = vmatpush.msrb.mxu1 %v1303_v34 }
 0x135   :  { %526 = vmatpush.msrb.mxu3 %v1310_v9 }
 0x136   :  { %401 = vperm.xlu1 %944, %v398_v19   ;;  %589 = vmatpush.msrb.mxu1 %v1310_v9  ;;  %v1333_v19 = vld [vmem:[%s1486_s6 + $0x88] sm:$0xff] }
 0x137   :  { %527 = vmatpush.msrb.mxu3 %v1317_v10 }
 0x138   :  { %590 = vmatpush.msrb.mxu1 %v1317_v10 }
 0x139   :  { %528 = vmatpush.msrb.mxu3 %v1324_v11 }
 0x13a   :  { %591 = vmatpush.msrb.mxu1 %v1324_v11 }
 0x13b   :  { %420 = vperm.xlu2 %942, %v1263_v20   ;;  %529 = vmatpush.msrb.mxu3 %v1333_v19 }
 0x13c   :  { %592 = vmatpush.msrb.mxu1 %v1333_v19 }
 0x143   :  { %428 = vperm.xlu2 %942, %v424_v21  }
 0x185   :  { %v388_v22 = vpop.permute.xlu2 %387 }
 0x186   :  { %v390_v25 = vmul.f32 %v388_v22, %v1203_v38 }
 0x188   :  { %v406_v28 = vrot.slane %v390_v25, 2 }
 0x18d   :  { %v381_v23 = vpop.permute.xlu2 %380 }
 0x18e   :  { %v383_v27 = vmul.f32 %v381_v23, %v1203_v38 }
 0x190   :  { %v408_v31 = vadd.f32 %v406_v28, %v383_v27 }
 0x195   :  { %v421_v30 = vpop.permute.xlu2 %420 }
 0x19d   :  { %v429_v42 = vpop.permute.xlu2 %428 }
 0x19e   :  { %v395_v24 = vpop.permute.xlu0 %394 }
 0x19f   :  { %v397_v26 = vmul.f32 %v395_v24, %v1203_v38  ;;  %v1341_v24 = vld [vmem:[%s1486_s6 + $0x80] sm:$0xff] }
 0x1a0   :  { %530 = vmatpush.msrb.mxu3 %v1341_v24  ;;  %593 = vmatpush.msrb.mxu1 %v1341_v24 }
 0x1a1   :  { %v410_v29 = vrot.slane %v397_v26, 4 }
 0x1a2   :  { %649 = vmatpush.msra.mxu1 %v1291_v7 }
 0x1a3   :  { %v412_v33 = vadd.f32 %v410_v29, %v408_v31 }
 0x1a4   :  { %650 = vmatpush.msra.mxu1 %v1296_v8 }
 0x1a5   :  { %v425_v39 = vmul.f32 0.33333334, %v412_v33 }
 0x1a6   :  { %651 = vmatpush.msra.mxu1 %v1303_v34 }
 0x1a7   :  { %v431_v43 = vmul.f32 %v429_v42, %v425_v39 }
 0x1a8   :  { %v402_v32 = vpop.permute.xlu1 %401  ;;  %652 = vmatpush.msra.mxu1 %v1310_v9 }
 0x1a9   :  { %v404_v35 = vmul.f32 %v402_v32, %v1203_v38 }
 0x1aa   :  { %653 = vmatpush.msra.mxu1 %v1317_v10 }
 0x1ab   :  { %v414_v36 = vrot.slane %v404_v35, 6 }
 0x1ac   :  { %654 = vmatpush.msra.mxu1 %v1324_v11 }
 0x1ad   :  { %v416_v40 = vadd.f32 %v414_v36, %v412_v33 }
 0x1ae   :  { %655 = vmatpush.msra.mxu1 %v1333_v19 }
 0x1af   :  { %v417_v41 = vmul.f32 0.25, %v416_v40 }
 0x1b0   :  { %656 = vmatpush.msra.mxu1 %v1341_v24 }
 0x1b1   :  { %v423_v44 = vmul.f32 %v421_v30, %v417_v41 }
 0x1b3   :  { %v432_v45 = vadd.f32 %v431_v43, %v423_v44 }
 0x1b5   :  { %v433_v46 = vmul.f32 0.17677669, %v432_v45  ;;  %v1369_v45 = vld [vmem:[%s1486_s6 + $0x78] sm:$0xff] }
 0x1b6   :  { %495 = vmatpush.msra.mxu2 %v1369_v45  ;;  %558 = vmatpush.msra.mxu0 %v1369_v45 }
 0x1b7   :  { %465 = vrot.lane.b32.xlu1 %v433_v46, %s1045_s1  ;;  %459 = vrot.lane.b32.xlu2 %v433_v46, %s1046_s16 }
 0x1b8   :  { %621 = vmatpush.msra.mxu3 %v1369_v45 }
 0x1bf   :  { %462 = vrot.lane.b32.xlu2 %v433_v46, %s1047_s17 }
 0x211   :  { %v460_v47 = vpop.permute.xlu2 %459 }
 0x212   :  { %v468_v48 = vsel %vm89_vm3, %v433_v46, %v460_v47  ;;  %vm473_vm3 = vcmp.eq.f32.partialorder %v1263_v20, 0.0  ;;  %v1374_v20 = vld [vmem:[%s1486_s6 + $0x70] sm:$0xff]  ;;  %v1389_v46 = vld [vmem:[%s1486_s6 + $0x60] sm:$0xff]  ;;  %v445_v47 = vld [vmem:[%s1486_s6 + $0x58] sm:$0xff] }
 0x213   :  { %478 = vrot.lane.b32.xlu1 %v468_v48, %s1047_s17  ;;  %v536_v58 = vrot.slane %v468_v48, 6  ;;  %v599_v59 = vrot.slane %v468_v48, 4  ;;  %v662_v61 = vrot.slane %v468_v48, 2  ;;  %v724_v44 = vsel %vm473_vm3, 1, %v1044_v12  ;;  %v1381_v12 = vld [vmem:[%s1486_s6 + $0x68] sm:$0xff]  ;;  %496 = vmatpush.msra.mxu2 %v1374_v20 }
 0x214   :  { %559 = vmatpush.msra.mxu0 %v1374_v20  ;;  %622 = vmatpush.msra.mxu3 %v1374_v20 }
 0x215   :  { %497 = vmatpush.msra.mxu2 %v1381_v12 }
 0x216   :  { %560 = vmatpush.msra.mxu0 %v1381_v12  ;;  %623 = vmatpush.msra.mxu3 %v1381_v12 }
 0x217   :  { %498 = vmatpush.msra.mxu2 %v1389_v46 }
 0x218   :  { %561 = vmatpush.msra.mxu0 %v1389_v46  ;;  %624 = vmatpush.msra.mxu3 %v1389_v46 }
 0x219   :  { %v463_v49 = vpop.permute.xlu2 %462  ;;  %499 = vmatpush.msra.mxu2 %v445_v47 }
 0x21a   :  { %v470_v50 = vsel %vm469_vm8, %v468_v48, %v463_v49  ;;  %v444_v48 = vld [vmem:[%s1486_s6 + $0x50] sm:$0xff]  ;;  %562 = vmatpush.msra.mxu0 %v445_v47  ;;  %v443_v49 = vld [vmem:[%s1486_s6 + $0x48] sm:$0xff]  ;;  %625 = vmatpush.msra.mxu3 %v445_v47 }
 0x21b   :  { %500 = vmatpush.msra.mxu2 %v444_v48 }
 0x21c   :  { %563 = vmatpush.msra.mxu0 %v444_v48  ;;  %626 = vmatpush.msra.mxu3 %v444_v48 }
 0x21d   :  { %501 = vmatpush.msra.mxu2 %v443_v49 }
 0x21e   :  { %564 = vmatpush.msra.mxu0 %v443_v49  ;;  %627 = vmatpush.msra.mxu3 %v443_v49 }
 0x229   :  { %v466_v53 = vpop.permute.xlu1 %465 }
 0x22a   :  { %v472_v54 = vsel %vm471_vm9, %v470_v50, %v466_v53  ;;  %v442_v50 = vld [vmem:[%s1486_s6 + $0x40] sm:$0xff]  ;;  %v441_v53 = vld [vmem:[%s1486_s6 + $0x38] sm:$0xff] }
 0x22b   :  { %476 = vrot.lane.b32.xlu2 %v472_v54, %s1047_s17  ;;  %v661_v55 = vrot.slane %v472_v54, 2  ;;  %v535_v57 = vrot.slane %v472_v54, 6  ;;  %v598_v62 = vrot.slane %v472_v54, 4  ;;  %502 = vmatpush.msra.mxu2 %v442_v50  ;;  %v440_v54 = vld [vmem:[%s1486_s6 + $0x30] sm:$0xff] }
 0x22c   :  { %565 = vmatpush.msra.mxu0 %v442_v50  ;;  %628 = vmatpush.msra.mxu3 %v442_v50 }
 0x22d   :  { %663 = vrot.lane.b32.xlu1 %v661_v55, %s1047_s17  ;;  %537 = vrot.lane.b32.xlu0 %v535_v57, %s1047_s17  ;;  %v439_v55 = vld [vmem:[%s1486_s6 + $0x28] sm:$0xff]  ;;  %v438_v57 = vld [vmem:[%s1486_s6 + $0x20] sm:$0xff] }
 0x22e   :  { %503 = vmatpush.msra.mxu2 %v441_v53  ;;  %566 = vmatpush.msra.mxu0 %v441_v53 }
 0x22f   :  { %629 = vmatpush.msra.mxu3 %v441_v53 }
 0x230   :  { %504 = vmatpush.msra.mxu2 %v440_v54  ;;  %567 = vmatpush.msra.mxu0 %v440_v54 }
 0x231   :  { %630 = vmatpush.msra.mxu3 %v440_v54 }
 0x232   :  { %505 = vmatpush.msra.mxu2 %v439_v55  ;;  %568 = vmatpush.msra.mxu0 %v439_v55 }
 0x233   :  { %539 = vrot.lane.b32.xlu2 %v536_v58, %s1047_s17  ;;  %v437_v58 = vld [vmem:[%s1486_s6 + $0x18] sm:$0xff]  ;;  %631 = vmatpush.msra.mxu3 %v439_v55 }
 0x234   :  { %506 = vmatpush.msra.mxu2 %v438_v57  ;;  %569 = vmatpush.msra.mxu0 %v438_v57 }
 0x235   :  { %602 = vrot.lane.b32.xlu1 %v599_v59, %s1047_s17  ;;  %665 = vrot.lane.b32.xlu0 %v662_v61, %s1047_s17  ;;  %v436_v59 = vld [vmem:[%s1486_s6 + $0x10] sm:$0xff]  ;;  %v435_v61 = vld [vmem:[%s1486_s6 + $0x8] sm:$0xff] }
 0x236   :  { %632 = vmatpush.msra.mxu3 %v438_v57  ;;  %507 = vmatpush.msra.mxu2 %v437_v58 }
 0x237   :  { %570 = vmatpush.msra.mxu0 %v437_v58 }
 0x238   :  { %633 = vmatpush.msra.mxu3 %v437_v58  ;;  %508 = vmatpush.msra.mxu2 %v436_v59 }
 0x239   :  { %571 = vmatpush.msra.mxu0 %v436_v59 }
 0x23a   :  { %634 = vmatpush.msra.mxu3 %v436_v59  ;;  %509 = vmatpush.msra.mxu2 %v435_v61 }
 0x23b   :  { %600 = vrot.lane.b32.xlu2 %v598_v62, %s1047_s17  ;;  %v434_v62 = vld [vmem:[%s1486_s6] sm:$0xff]  ;;  %572 = vmatpush.msra.mxu0 %v435_v61  ;;  %s1048_s6 = smov 3  }
 0x23c   :  { %635 = vmatpush.msra.mxu3 %v435_v61  ;;  %510 = vmatpush.msra.mxu2 %v434_v62 }
 0x23d   :  { %573 = vmatpush.msra.mxu0 %v434_v62 }
 0x23e   :  { %684 = vmatpush.msrb.mxu2 %v1369_v45  ;;  %636 = vmatpush.msra.mxu3 %v434_v62 }
 0x23f   :  { %712 = vmatpush.msrb.mxu0 %v1291_v7 }
 0x240   :  { %685 = vmatpush.msrb.mxu2 %v1374_v20 }
 0x241   :  { %713 = vmatpush.msrb.mxu0 %v1296_v8 }
 0x242   :  { %686 = vmatpush.msrb.mxu2 %v1381_v12 }
 0x243   :  { %714 = vmatpush.msrb.mxu0 %v1303_v34 }
 0x244   :  { %687 = vmatpush.msrb.mxu2 %v1389_v46 }
 0x245   :  { %715 = vmatpush.msrb.mxu0 %v1310_v9 }
 0x246   :  { %688 = vmatpush.msrb.mxu2 %v445_v47 }
 0x247   :  { %716 = vmatpush.msrb.mxu0 %v1317_v10 }
 0x248   :  { %689 = vmatpush.msrb.mxu2 %v444_v48 }
 0x249   :  { %717 = vmatpush.msrb.mxu0 %v1324_v11 }
 0x24a   :  { %690 = vmatpush.msrb.mxu2 %v443_v49 }
 0x24b   :  { %718 = vmatpush.msrb.mxu0 %v1333_v19 }
 0x24c   :  { %691 = vmatpush.msrb.mxu2 %v442_v50 }
 0x24d   :  { %719 = vmatpush.msrb.mxu0 %v1341_v24 }
 0x24e   :  { %692 = vmatpush.msrb.mxu2 %v441_v53 }
 0x250   :  { %693 = vmatpush.msrb.mxu2 %v440_v54 }
 0x252   :  { %694 = vmatpush.msrb.mxu2 %v439_v55 }
 0x254   :  { %695 = vmatpush.msrb.mxu2 %v438_v57 }
 0x256   :  { %696 = vmatpush.msrb.mxu2 %v437_v58 }
 0x258   :  { %697 = vmatpush.msrb.mxu2 %v436_v59 }
 0x25a   :  { %698 = vmatpush.msrb.mxu2 %v435_v61 }
 0x25c   :  { %699 = vmatpush.msrb.mxu2 %v434_v62 }
 0x285   :  { %v479_v3 = vpop.permute.xlu1 %478  ;;  %v477_v4 = vpop.permute.xlu2 %476 }
 0x286   :  { %v480_v5 = vsel %vm469_vm8, %v477_v4, %v479_v3  ;;  %v483_v22 = vmul.f32 %v477_v4, %v1203_v38 }
 0x287   :  { %v484_v6 = vmul.f32 %v480_v5, %v131_v0 }
 0x289   :  { %489 = vrot.lane.b32.xlu2 %v484_v6, %s1047_s17 }
 0x28d   :  { %v540_v37 = vpop.permute.xlu2 %539 }
 0x295   :  { %v601_v25 = vpop.permute.xlu2 %600 }
 0x296   :  { %v607_v29 = vmul.f32 %v601_v25, %v1203_v38 }
 0x298   :  { %v611_v40 = vrot.slane %v607_v29, 4 }
 0x29f   :  { %v664_v14 = vpop.permute.xlu1 %663  ;;  %v538_v15 = vpop.permute.xlu0 %537 }
 0x2a0   :  { %v541_v16 = vsel %vm469_vm8, %v538_v15, %v540_v37  ;;  %v544_v17 = vmul.f32 %v538_v15, %v1203_v38  ;;  %v670_v27 = vmul.f32 %v664_v14, %v1203_v38 }
 0x2a1   :  { %v545_v21 = vmul.f32 %v541_v16, %v131_v0 }
 0x2a2   :  { %v548_v23 = vrot.slane %v544_v17, 2  ;;  %v674_v32 = vrot.slane %v670_v27, 6 }
 0x2a3   :  { %v549_v26 = vrot.slane %v545_v21, 2  ;;  %v753_v21 = vlaneseq }
 0x2a4   :  { %v945_v28 = vpack.i.bf16 %v548_v23, %v483_v22  ;;  %v950_v43 = vpack.i.bf16 %v611_v40, %v674_v32 }
 0x2a5   :  { %552 = vrot.lane.b32.xlu1 %v549_v26, %s1047_s17  ;;  %v754_v22 = vshrl.u32 %v753_v21, 7  ;;  %v796_v21 = vperm.slane %v1215_v51, 0 }
 0x2a6   :  { %946 = vrot.lane.b32.xlu0 %v945_v28, %s1047_s17 }
 0x2a7   :  { %v603_v30 = vpop.permute.xlu1 %602  ;;  %v666_v31 = vpop.permute.xlu0 %665  ;;  %956 = vset.pattern.permute.xlu1 %v754_v22  ;;  %955 = vset.pattern.permute.xlu2 %v754_v22 }
 0x2a8   :  { %v604_v33 = vsel %vm469_vm8, %v601_v25, %v603_v30  ;;  %v667_v35 = vsel %vm469_vm8, %v664_v14, %v666_v31 }
 0x2a9   :  { %v608_v36 = vmul.f32 %v604_v33, %v131_v0  ;;  %v671_v39 = vmul.f32 %v667_v35, %v131_v0 }
 0x2ab   :  { %v612_v41 = vrot.slane %v608_v36, 4  ;;  %v675_v42 = vrot.slane %v671_v39, 6 }
 0x2ad   :  { %615 = vrot.lane.b32.xlu1 %v612_v41, %s1047_s17  ;;  %678 = vrot.lane.b32.xlu2 %v675_v42, %s1047_s17 }
 0x2ae   :  { %951 = vrot.lane.b32.xlu0 %v950_v43, %s1047_s17  ;;  %s1050_s17 = smov 1  }
 0x2b6   :  { %726 = vperm.xlu0 %943, %v724_v44  }
 0x2be   :  { %957 = vset.pattern.permute.xlu0 %v754_v22  ;;  %v855_v22 = vld [vmem:[#allocation1 + $0x7] ss:$9 sm:$0xff] }
 0x2e3   :  { %v490_v63 = vpop.permute.xlu2 %489 }
 0x2e4   :  { %929 = vmatmul.msk.f32.vlgmr.msrb.gmra.mxu3 %vm469_vm8, %v490_v63 }
 0x307   :  { %v679_v10 = vpop.permute.xlu2 %678 }
 0x317   :  { %v553_v0 = vpop.permute.xlu1 %552 }
 0x318   :  { %930 = vmatmul.msk.f32.vlgmr.msrb.gmra.mxu1 %vm469_vm8, %v553_v0  ;;  %v947_v3 = vpop.permute.xlu0 %946 }
 0x319   :  { %v949_v4 = vunpack.i.h.bf16 %v947_v3  ;;  %v948_v5 = vunpack.i.l.bf16 %v947_v3 }
 0x31b   :  { %v491_v6 = vsel %vm469_vm8, %v948_v5, %v490_v63  ;;  %v554_v7 = vsel %vm469_vm8, %v949_v4, %v553_v0  ;;  %v365_v5 = vrot.slane %v1251_v60, 4  ;;  %v797_v60 = vperm.slane %v1217_v52, 0 }
 0x31c   :  { %511 = vmatmul.f32.vlgmr.msra.gmra.mxu2 %v491_v6  ;;  %574 = vmatmul.f32.vlgmr.msra.gmra.mxu0 %v554_v7 }
 0x31f   :  { %v616_v8 = vpop.permute.xlu1 %615 }
 0x320   :  { %931 = vmatmul.msk.f32.vlgmr.msra.gmra.mxu1 %vm469_vm8, %v616_v8  ;;  %v952_v34 = vpop.permute.xlu0 %951 }
 0x321   :  { %v954_v37 = vunpack.i.h.bf16 %v952_v34  ;;  %v953_v9 = vunpack.i.l.bf16 %v952_v34  ;;  %v355_v34 = vrot.slane %v1248_v56, 2  ;;  %v827_v56 = vperm.slane %v1229_v2, 0 }
 0x322   :  { %v826_v2 = vperm.slane %v1227_v1, 0 }
 0x323   :  { %v617_v11 = vsel %vm469_vm8, %v954_v37, %v616_v8  ;;  %v680_v14 = vsel %vm469_vm8, %v953_v9, %v679_v10  ;;  %v360_v8 = vrot.slane %v1257_v18, 6 }
 0x324   :  { %637 = vmatmul.f32.vlgmr.msra.gmra.mxu3 %v617_v11  ;;  %700 = vmatmul.f32.vlgmr.msrb.gmra.mxu2 %v680_v14 }
 0x325   :  { %932 = vmatmul.msk.f32.vlgmr.msrb.gmra.mxu0 %vm469_vm8, %v679_v10  ;;  %v767_v10 = vrot.slane %v1203_v38, 1 }
 0x327   :  { %v769_v14 = vperm.slane %v767_v10, 0 }
 0x328   :  { %v727_v23 = vpop.permute.xlu0 %726 }
 0x329   :  { %vm728_vm10 = vcmp.eq.s32.totalorder %v727_v23, 1  ;;  %v768_v23 = vperm.slane %v1203_v38, 0 }
 0x367   :  { %v532_v17 = vpop.f32.mrf.mxu3 }
 0x395   :  { %v595_v15 = vpop.f32.mrf.mxu1 }
 0x399   :  { %v575_v16 = vpop.f32.mrf.mxu0 }
 0x39a   :  { %v596_v31 = vadd.f32 %v595_v15, %v575_v16 }
 0x39d   :  { %v658_v24 = vpop.f32.mrf.mxu1 }
 0x39f   :  { %v512_v19 = vpop.f32.mrf.mxu2 }
 0x3a0   :  { %v533_v26 = vadd.f32 %v532_v17, %v512_v19 }
 0x3a2   :  { %v721_v25 = vpop.f32.mrf.mxu0  ;;  %v730_v33 = vmax.f32 %v533_v26, %v596_v31 }
 0x3a7   :  { %v638_v27 = vpop.f32.mrf.mxu3  ;;  %v701_v28 = vpop.f32.mrf.mxu2 }
 0x3a8   :  { %v659_v29 = vadd.f32 %v658_v24, %v638_v27  ;;  %v722_v30 = vadd.f32 %v721_v25, %v701_v28  ;;  %v857_v27 = vperm.slane %v855_v22, 0 }
 0x3aa   :  { %v729_v32 = vsel %vm728_vm10, -inf, %v722_v30 }
 0x3ab   :  { %v731_v35 = vmax.f32 %v659_v29, %v729_v32 }
 0x3ad   :  { %v732_v36 = vmax.f32 %v730_v33, %v731_v35  ;;  %v853_v35 = vld [vmem:[#allocation1 + $0x6] ss:$9 sm:$0xff] }
 0x3af   :  { %v733_v39 = vsub.f32 %v533_v26, %v732_v36  ;;  %v736_v40 = vsub.f32 %v596_v31, %v732_v36  ;;  %v739_v41 = vsub.f32 %v659_v29, %v732_v36  ;;  %v742_v42 = vsub.f32 %v729_v32, %v732_v36 }
 0x3b0   :  { %v856_v36 = vperm.slane %v853_v35, 0 }
 0x3b1   :  { %v734_v43 = vmul.f32 1.442695, %v733_v39  ;;  %v737_v44 = vmul.f32 1.442695, %v736_v40  ;;  %v740_v45 = vmul.f32 1.442695, %v739_v41 }
 0x3b2   :  { %v743_v20 = vmul.f32 1.442695, %v742_v42 }
 0x3b3   :  { %982 = vpow2.f32 %v734_v43 }
 0x3b4   :  { %984 = vpow2.f32 %v737_v44 }
 0x3b5   :  { %986 = vpow2.f32 %v740_v45 }
 0x3b6   :  { %988 = vpow2.f32 %v743_v20 }
 0x3b9   :  { %v983_v12 = vpop.eup %982 }
 0x3ba   :  { %v985_v46 = vpop.eup %984 }
 0x3bb   :  { %v745_v47 = vadd.f32 %v985_v46, %v983_v12  ;;  %v987_v48 = vpop.eup %986 }
 0x3bc   :  { %v989_v50 = vpop.eup %988 }
 0x3bd   :  { %v746_v49 = vadd.f32 %v987_v48, %v745_v47 }
 0x3bf   :  { %v747_v53 = vadd.f32 %v989_v50, %v746_v49 }
 0x3c1   :  { %990 = vrcp.f32 %v747_v53 }
 0x3c7   :  { %v991_v54 = vpop.eup %990 }
 0x3c8   :  { %v774_v55 = vmul.f32 %v991_v54, %v985_v46  ;;  %v749_v57 = vmul.f32 %v991_v54, %v983_v12  ;;  %v834_v58 = vmul.f32 %v991_v54, %v989_v50  ;;  %v804_v59 = vmul.f32 %v991_v54, %v987_v48 }
 0x3ca   :  { %v777_v61 = vperm.slane %v774_v55, 0  ;;  %776 = vst.msk [vmem:[#allocation2 + $0x2] sm:$0x3] %vm750_vm11, %v774_v55  ;;  %v759_v62 = vperm.slane %v749_v57, 1  ;;  %v752_v63 = vperm.slane %v749_v57, 0  ;;  %v844_v0 = vperm.slane %v834_v58, 1 }
 0x3cb   :  { %751 = vst.msk [vmem:[#allocation2] sm:$0x3] %vm750_vm11, %v749_v57  ;;  %v807_v3 = vperm.slane %v804_v59, 0  ;;  %v784_v4 = vperm.slane %v774_v55, 1  ;;  %v837_v6 = vperm.slane %v834_v58, 0  ;;  %v814_v7 = vperm.slane %v804_v59, 1 }
 0x3cc   :  { %782 = vperm.xlu0 %957, %v777_v61   ;;  %764 = vperm.xlu1 %956, %v759_v62   ;;  %836 = vst.msk [vmem:[#allocation2 + $0x6] sm:$0x3] %vm750_vm11, %v834_v58 }
 0x3cd   :  { %757 = vperm.xlu2 %955, %v752_v63   ;;  %806 = vst.msk [vmem:[#allocation2 + $0x4] sm:$0x3] %vm750_vm11, %v804_v59 }
 0x3ce   :  { %889 = dma.vmem_to_hbm [thread:$0]  %s882_s22, 128, %s884_s20, [#allocation3], %s1046_s16, %s1046_s16, %s1049_s15  }
 0x3cf   :  { %s895_s16 = sshll.u32 %s1052_s8, 4  ;;  %s896_s16 = int_to_ptr.vmem [resolvable:$true] %s895_s16 }
 0x3d4   :  { %849 = vperm.xlu0 %957, %v844_v0   ;;  %812 = vperm.xlu1 %956, %v807_v3  }
 0x3d5   :  { %789 = vperm.xlu2 %955, %v784_v4  }
 0x3dc   :  { %366 = vrot.lane.b32.xlu0 %v365_v5, %s1048_s6  ;;  %842 = vperm.xlu1 %956, %v837_v6  }
 0x3dd   :  { %819 = vperm.xlu2 %955, %v814_v7  }
 0x3e4   :  { %361 = vrot.lane.b32.xlu1 %v360_v8, %s1049_s15 }
 0x3e5   :  { %356 = vrot.lane.b32.xlu2 %v355_v34, %s1050_s17 }
 0x427   :  { %v758_v37 = vpop.permute.xlu2 %757 }
 0x428   :  { %v772_v26 = vmul.f32 %v768_v23, %v758_v37 }
 0x42f   :  { %v790_v9 = vpop.permute.xlu2 %789 }
 0x430   :  { %v801_v18 = vmul.f32 %v797_v60, %v790_v9 }
 0x437   :  { %v820_v11 = vpop.permute.xlu2 %819 }
 0x438   :  { %v831_v19 = vmul.f32 %v827_v56, %v820_v11 }
 0x43e   :  { %v783_v15 = vpop.permute.xlu0 %782  ;;  %v765_v16 = vpop.permute.xlu1 %764 }
 0x43f   :  { %v773_v17 = vmul.f32 %v769_v14, %v765_v16  ;;  %v800_v24 = vmul.f32 %v796_v21, %v783_v15  ;;  %v357_v41 = vpop.permute.xlu2 %356 }
 0x440   :  { %v370_v1 = vsel %vm369_vm12, %v1254_v13, %v357_v41 }
 0x441   :  { %v803_v52 = vadd.f32 %v801_v18, %v773_v17  ;;  %v802_v30 = vadd.f32 %v800_v24, %v772_v26 }
 0x443   :  { %v833_v25 = vadd.f32 %v831_v19, %v803_v52 }
 0x446   :  { %v850_v28 = vpop.permute.xlu0 %849  ;;  %v813_v29 = vpop.permute.xlu1 %812 }
 0x447   :  { %v861_v31 = vmul.f32 %v857_v27, %v850_v28  ;;  %v830_v32 = vmul.f32 %v826_v2, %v813_v29 }
 0x449   :  { %v863_v33 = vadd.f32 %v861_v31, %v833_v25  ;;  %v832_v51 = vadd.f32 %v830_v32, %v802_v30 }
 0x44b   :  { %868 = vrot.lane.b32.xlu1 %v863_v33, %s1045_s1 }
 0x44e   :  { %v843_v39 = vpop.permute.xlu1 %842  ;;  %v367_v43 = vpop.permute.xlu0 %366 }
 0x44f   :  { %v860_v40 = vmul.f32 %v856_v36, %v843_v39 }
 0x451   :  { %v862_v38 = vadd.f32 %v860_v40, %v832_v51 }
 0x453   :  { %866 = vrot.lane.b32.xlu2 %v862_v38, %s1045_s1 }
 0x456   :  { %v362_v42 = vpop.permute.xlu1 %361 }
 0x457   :  { %v372_v44 = vsel %vm371_vm13, %v370_v1, %v362_v42 }
 0x458   :  { %v374_v45 = vsel %vm373_vm14, %v372_v44, %v367_v43 }
 0x459   :  { %376 = vst.msk [vmem:[#allocation4] sm:$0x3] %vm375_vm15, %v374_v45 }
 0x45a   :  { %900 = dma.vmem_to_hbm [thread:$0]  %s896_s16, 32, %s898_s3, [#allocation5]  }
 0x4ad   :  { %v867_v20 = vpop.permute.xlu2 %866 }
 0x4ae   :  { %873 = vst.msk [vmem:[%s1487_s7] sm:$0x3f] %vm872_vm0, %v867_v20 }
 0x4bd   :  { %v869_v12 = vpop.permute.xlu1 %868 }
 0x4be   :  { %874 = vst.msk [vmem:[%s1487_s7 + $0x8] sm:$0x3f] %vm872_vm0, %v869_v12 }
 0x4bf   :  { %1040 = dma.done.wait [#allocation3], 128  }
 0x4c0   :  { %1041 = vsyncadd [#allocation3], 4294967168 }
 0x4c1   :  { %1042 = dma.done.wait [#allocation5], 32  }
 0x4c2   :  { %1043 = vsyncadd [#allocation5], 4294967264 }
 0x4c3   :  { %911 = vsyncpa [#allocation3], 1 }
 0x4c4   :  { %912 = vsyncpa [#allocation5], 1 }

</bundles_post_ra>
